<compile_context>
chip_gen: v7x
topology: tpu7x:2x2x1
jax: 0.10.0
libtpu: 0.0.40
codegen_flags: <defaults>
</compile_context>

<pallas_src>
import functools

import jax
import jax.numpy as jnp
from jax import lax
from jax.experimental import pallas as pl
from jax.experimental.pallas import tpu as pltpu


def _round_up(v, m):
    return (v + m - 1) // m * m


def _dwconv_fused_kernel(x_hbm, wc_ref, bc_ref, o_ref, xbuf, sem, *,
                         ksize, stride, RT, Wo, in_rows, Cpad, Copad):
    """One (batch, row-tile) grid step.

    x_hbm : (N, Hp, Wp, Cpad)  zero-padded NHWC input, left in HBM (pl.ANY)
    wc_ref: (k*k, Cpad, Copad) fused depthwise*BN*pointwise*BN weight, row t = ki*k+kj
    bc_ref: (1, Copad)         fused bias (depthwise BN bias folded through pointwise)
    o_ref : (1, RT, Wo, Copad) output row tile (lane-dense last dim)
    xbuf  : (2, in_rows, Wp, Cpad) VMEM double buffer for the input rows (+halo)
    sem   : DMA semaphores, one per slot
    """
    n = pl.program_id(0)
    r = pl.program_id(1)
    num_r = pl.num_programs(1)
    slot = r % 2

    def _issue(row_tile_idx, s):
        row0 = row_tile_idx * (RT * stride)
        pltpu.make_async_copy(x_hbm.at[n, pl.ds(row0, in_rows)],
                              xbuf.at[s], sem.at[s]).start()

    # Prime the double buffer at the first row tile of every batch element
    # (self-contained per batch element, so the batch axis can be core-parallel).
    @pl.when(r == 0)
    def _():
        _issue(0, 0)

    # Wait for the current row tile's input rows.
    pltpu.make_async_copy(x_hbm.at[n, pl.ds(0, in_rows)],
                          xbuf.at[slot], sem.at[slot]).wait()

    # Prefetch the next row tile of the same batch element into the other slot.
    @pl.when(r + 1 < num_r)
    def _():
        _issue(r + 1, 1 - slot)

    xt = xbuf[slot]                               # (in_rows, Wp, Cpad)

    # Implicit im2col: k*k shifted windows, each contracted on the MXU against the
    # fused (Cpad, Copad) weight slice, accumulated in one small f32 accumulator.
    acc = jnp.zeros((RT * Wo, Copad), jnp.float32)
    for di in range(ksize):
        for dj in range(ksize):
            if stride == 1:
                win = xt[di:di + RT, dj:dj + Wo, :]
            else:
                # TODO(synk): stride>1 uses strided sublane slicing (functional but
                # slow); a faster path would DMA pre-strided row phases.
                win = lax.slice(
                    xt, (di, dj, 0),
                    (di + (RT - 1) * stride + 1, dj + (Wo - 1) * stride + 1, Cpad),
                    (stride, stride, 1))
            acc = acc + jnp.dot(win.reshape(RT * Wo, Cpad),
                                wc_ref[di * ksize + dj],
                                preferred_element_type=jnp.float32)

    z = acc + bc_ref[...]                                   # pointwise BN bias (fused)
    z = z * jnp.clip(z + 3.0, 0.0, 6.0) * (1.0 / 6.0)       # hardswish
    o_ref[0] = z.reshape(RT, Wo, Copad).astype(o_ref.dtype)


def dwconv_forward(x_nchw, dw_w, pw_w, dbn, pbn, *, ksize, stride=1,
                   eps=1e-5, row_tile=8):
    """x_nchw: (N, C, H, W) f32.  dw_w: (C,1,k,k), pw_w: (Cout,C,1,1) PyTorch layouts.
    dbn/pbn: (gamma, beta, running_mean, running_var).  Returns (N, Cout, Ho, Wo)."""
    N, C, H, W = x_nchw.shape
    Cout = pw_w.shape[0]
    pad = (ksize - 1) // 2

    d_gamma, d_beta, d_mean, d_var = dbn
    p_gamma, p_beta, p_mean, p_var = pbn
    d_scale = d_gamma / jnp.sqrt(d_var + eps)
    d_bias = d_beta - d_mean * d_scale
    p_scale = p_gamma / jnp.sqrt(p_var + eps)
    p_bias = p_beta - p_mean * p_scale

    dw = jnp.transpose(dw_w[:, 0], (1, 2, 0)).reshape(ksize * ksize, C)   # (k*k, C)
    pw = jnp.transpose(pw_w[:, :, 0, 0], (1, 0))                          # (C, Cout)

    # Fold both BNs + depthwise weight into one im2col weight & bias.
    wc = (dw[:, :, None] * d_scale[None, :, None]) * (pw * p_scale[None, :])[None]
    bc = p_scale * (d_bias @ pw) + p_bias                                 # (Cout,)

    Cpad = _round_up(C, 128)
    Copad = _round_up(Cout, 128)
    kk = ksize * ksize
    wc_p = jnp.zeros((kk, Cpad, Copad), jnp.float32).at[:, :C, :Cout].set(wc)
    bc_p = jnp.zeros((1, Copad), jnp.float32).at[0, :Cout].set(bc)

    Ho = (H + 2 * pad - ksize) // stride + 1
    Wo = (W + 2 * pad - ksize) // stride + 1
    RT = max(1, min(row_tile, Ho))                 # output rows per grid step
    num_r = pl.cdiv(Ho, RT)
    Ho_pad = num_r * RT
    in_rows = (RT - 1) * stride + ksize            # input rows incl. halo per tile
    Hp = (Ho_pad - 1) * stride + ksize
    Hp_arr = max(Hp, H + 2 * pad)
    Wp = W + 2 * pad

    # NCHW -> NHWC, zero-pad spatial dims and the channel (lane) dim.
    # TODO(synk): keep activations NHWC end-to-end in a full model so these wrapper
    # transposes/pads fuse away instead of costing extra HBM passes.
    x = jnp.transpose(x_nchw, (0, 2, 3, 1))
    xp = jnp.pad(x, ((0, 0), (pad, Hp_arr - H - pad), (pad, pad), (0, Cpad - C)))

    kernel = functools.partial(
        _dwconv_fused_kernel, ksize=ksize, stride=stride, RT=RT, Wo=Wo,
        in_rows=in_rows, Cpad=Cpad, Copad=Copad)

    flops = 2 * N * Ho_pad * Wo * kk * Cpad * Copad
    bytes_accessed = 4 * (N * Hp_arr * Wp * Cpad + N * Ho_pad * Wo * Copad
                          + kk * Cpad * Copad + Copad)
    # Rough VMEM need: input double buffer + (double-buffered) weights + output tiles.
    vmem_need = 4 * (2 * in_rows * Wp * Cpad + 2 * kk * Cpad * Copad
                     + 6 * RT * Wo * Copad)
    vmem_limit = int(min(max(2 * vmem_need, 16 * 1024 * 1024), 64 * 1024 * 1024))

    out = pl.pallas_call(
        kernel,
        out_shape=jax.ShapeDtypeStruct((N, Ho_pad, Wo, Copad), x.dtype),
        grid=(N, num_r),
        in_specs=[
            pl.BlockSpec(memory_space=pl.ANY),                       # input stays in HBM
            # Grid-invariant weights/bias (fetched once; block index never changes).
            pl.BlockSpec((kk, Cpad, Copad), lambda n, r: (0, 0, 0)),
            pl.BlockSpec((1, Copad), lambda n, r: (0, 0)),
        ],
        out_specs=pl.BlockSpec((1, RT, Wo, Copad), lambda n, r: (n, r, 0, 0)),
        scratch_shapes=[
            pltpu.VMEM((2, in_rows, Wp, Cpad), xp.dtype),
            pltpu.SemaphoreType.DMA((2,)),
        ],
        compiler_params=pltpu.CompilerParams(
            dimension_semantics=("parallel", "arbitrary"),
            vmem_limit_bytes=vmem_limit),
        cost_estimate=pl.CostEstimate(
            flops=flops, transcendentals=0, bytes_accessed=bytes_accessed),
    )(xp, wc_p, bc_p)

    out = out[:, :Ho, :, :Cout]                    # drop channel / row padding
    return jnp.transpose(out, (0, 3, 1, 2))        # back to NCHW


# ------------------------------ reference (plain JAX, for checking) ------------------------------
def _hardswish(x):
    return x * jnp.clip(x + 3.0, 0.0, 6.0) / 6.0


def _bn(x_nchw, gamma, beta, mean, var, eps=1e-5):
    scale = gamma / jnp.sqrt(var + eps)
    bias = beta - mean * scale
    return x_nchw * scale[None, :, None, None] + bias[None, :, None, None]


def dwconv_reference(x, dw_w, pw_w, dbn, pbn, *, ksize, stride=1):
    C = x.shape[1]
    pad = (ksize - 1) // 2
    dn = ("NCHW", "OIHW", "NCHW")
    y = lax.conv_general_dilated(x, dw_w, window_strides=(stride, stride),
                                 padding=[(pad, pad), (pad, pad)],
                                 dimension_numbers=dn, feature_group_count=C)
    y = _bn(y, *dbn)                      # dconv: no activation (no_depth_act=True)
    z = lax.conv_general_dilated(y, pw_w, window_strides=(1, 1),
                                 padding=[(0, 0), (0, 0)], dimension_numbers=dn)
    z = _bn(z, *pbn)
    return _hardswish(z)                  # pconv: hardswish


if __name__ == "__main__":
    # Small, deterministic setup: N=2, C_in=4, C_out=8, H=W=16, ksize=3, stride=1.
    N, C, Cout, H, W = 2, 4, 8, 16, 16
    ksize, stride = 3, 1

    key = jax.random.PRNGKey(0)
    ks = jax.random.split(key, 11)

    x = jax.random.normal(ks[0], (N, C, H, W), jnp.float32)

    # Parameters in PyTorch layouts.
    dw_w = jax.random.normal(ks[1], (C, 1, ksize, ksize), jnp.float32) * 0.2     # depthwise weight
    pw_w = jax.random.normal(ks[2], (Cout, C, 1, 1), jnp.float32) * 0.2          # pointwise weight
    d_gamma = 1.0 + 0.1 * jax.random.normal(ks[3], (C,), jnp.float32)
    d_beta = 0.1 * jax.random.normal(ks[4], (C,), jnp.float32)
    d_mean = 0.1 * jax.random.normal(ks[5], (C,), jnp.float32)
    d_var = jax.random.uniform(ks[6], (C,), jnp.float32, 0.5, 1.5)
    p_gamma = 1.0 + 0.1 * jax.random.normal(ks[7], (Cout,), jnp.float32)
    p_beta = 0.1 * jax.random.normal(ks[8], (Cout,), jnp.float32)
    p_mean = 0.1 * jax.random.normal(ks[9], (Cout,), jnp.float32)
    p_var = jax.random.uniform(ks[10], (Cout,), jnp.float32, 0.5, 1.5)

    out = dwconv_forward(x, dw_w, pw_w,
                         (d_gamma, d_beta, d_mean, d_var),
                         (p_gamma, p_beta, p_mean, p_var),
                         ksize=ksize, stride=stride)
    out = jax.block_until_ready(out)

    ref = dwconv_reference(x, dw_w, pw_w,
                           (d_gamma, d_beta, d_mean, d_var),
                           (p_gamma, p_beta, p_mean, p_var),
                           ksize=ksize, stride=stride)
    ref = jax.block_until_ready(ref)

    assert out.shape == (N, Cout, H, W), out.shape
    max_err = float(jnp.max(jnp.abs(out - ref)))
    assert max_err < 5e-3, max_err
    print("KERNEL_OK")
</pallas_src>

<mosaic_0001>
module attributes {stable_mosaic.version = 11 : i64} {
  func.func @_dwconv_fused_kernel(%arg0: i32, %arg1: i32, %arg2: memref<2x18x18x128xf32, #tpu.memory_space<any>>, %arg3: memref<9x128x128xf32, #tpu.memory_space<vmem>>, %arg4: memref<1x128xf32, #tpu.memory_space<vmem>>, %arg5: memref<1x8x16x128xf32, #tpu.memory_space<vmem>>, %arg6: memref<2x10x18x128xf32, #tpu.memory_space<vmem>>, %arg7: memref<2x!tpu.dma_semaphore, #tpu.memory_space<semaphore_mem>>) attributes {dimension_semantics = [#tpu.dimension_semantics<parallel>, #tpu.dimension_semantics<arbitrary>], iteration_bounds = array<i64: 2, 2>, scalar_prefetch = 0 : i64, scratch_operands = 2 : i64, tpu.core_type = #tpu.core_type<tc>, window_params = [{}, {pipeline_mode = #tpu.pipeline_mode<synchronous>, transform_indices = @transform_1, window_bounds = array<i64: 9, 128, 128>}, {pipeline_mode = #tpu.pipeline_mode<synchronous>, transform_indices = @transform_2, window_bounds = array<i64: 1, 128>}, {transform_indices = @transform_3, window_bounds = array<i64: 1, 8, 16, 128>}]} {
    %c2_i32 = arith.constant 2 : i32
    %c0_i32 = arith.constant 0 : i32
    %0 = arith.cmpi eq, %c2_i32, %c0_i32 : i32
    %c1_i32 = arith.constant 1 : i32
    %1 = arith.select %0, %c1_i32, %c2_i32 : i32
    %2 = arith.remsi %arg1, %1 : i32
    %c0_i32_0 = arith.constant 0 : i32
    %3 = arith.cmpi ne, %2, %c0_i32_0 : i32
    %c0_i32_1 = arith.constant 0 : i32
    %4 = arith.cmpi slt, %2, %c0_i32_1 : i32
    %c0_i32_2 = arith.constant 0 : i32
    %5 = arith.cmpi slt, %1, %c0_i32_2 : i32
    %6 = arith.xori %4, %5 : i1
    %7 = arith.andi %6, %3 : i1
    %8 = arith.addi %2, %1 : i32
    %9 = arith.select %7, %8, %2 : i32
    %c0_i32_3 = arith.constant 0 : i32
    %10 = arith.cmpi eq, %arg1, %c0_i32_3 : i32
    %11 = arith.extui %10 : i1 to i32
    %c0_i32_4 = arith.constant 0 : i32
    %12 = arith.cmpi ne, %11, %c0_i32_4 : i32
    scf.if %12 {
      %c0_i32_54 = arith.constant 0 : i32
      %c0_i32_55 = arith.constant 0 : i32
      %c0_i32_56 = arith.constant 0 : i32
      %c0_i32_57 = arith.constant 0 : i32
      %c0_i32_58 = arith.constant 0 : i32
      %97 = tpu.memref_slice %arg2[%arg0, %c0_i32_56, %c0_i32_57, %c0_i32_58] : memref<2x18x18x128xf32, #tpu.memory_space<any>> -> memref<1x10x18x128xf32, #tpu.memory_space<any>>
      %98 = tpu.memref_squeeze %97 : memref<1x10x18x128xf32, #tpu.memory_space<any>> -> memref<10x18x128xf32, #tpu.memory_space<any>>
      %c0_i32_59 = arith.constant 0 : i32
      %c0_i32_60 = arith.constant 0 : i32
      %c0_i32_61 = arith.constant 0 : i32
      %99 = tpu.memref_slice %arg6[%c0_i32_54, %c0_i32_59, %c0_i32_60, %c0_i32_61] : memref<2x10x18x128xf32, #tpu.memory_space<vmem>> -> memref<1x10x18x128xf32, #tpu.memory_space<vmem>>
      %100 = tpu.memref_squeeze %99 : memref<1x10x18x128xf32, #tpu.memory_space<vmem>> -> memref<10x18x128xf32, #tpu.memory_space<vmem>>
      %101 = tpu.memref_slice %arg7[%c0_i32_55] : memref<2x!tpu.dma_semaphore, #tpu.memory_space<semaphore_mem>> -> memref<1x!tpu.dma_semaphore, #tpu.memory_space<semaphore_mem>>
      %102 = tpu.memref_squeeze %101 : memref<1x!tpu.dma_semaphore, #tpu.memory_space<semaphore_mem>> -> memref<!tpu.dma_semaphore, #tpu.memory_space<semaphore_mem>>
      tpu.enqueue_dma source(%98 : memref<10x18x128xf32, #tpu.memory_space<any>>) target(%100 : memref<10x18x128xf32, #tpu.memory_space<vmem>>) target_semaphore(%102 : memref<!tpu.dma_semaphore, #tpu.memory_space<semaphore_mem>>)
    } else {
    }
    %c0_i32_5 = arith.constant 0 : i32
    %c0_i32_6 = arith.constant 0 : i32
    %c0_i32_7 = arith.constant 0 : i32
    %13 = tpu.memref_slice %arg2[%arg0, %c0_i32_5, %c0_i32_6, %c0_i32_7] : memref<2x18x18x128xf32, #tpu.memory_space<any>> -> memref<1x10x18x128xf32, #tpu.memory_space<any>>
    %14 = tpu.memref_squeeze %13 : memref<1x10x18x128xf32, #tpu.memory_space<any>> -> memref<10x18x128xf32, #tpu.memory_space<any>>
    %c0_i32_8 = arith.constant 0 : i32
    %c0_i32_9 = arith.constant 0 : i32
    %c0_i32_10 = arith.constant 0 : i32
    %15 = tpu.memref_slice %arg6[%9, %c0_i32_8, %c0_i32_9, %c0_i32_10] : memref<2x10x18x128xf32, #tpu.memory_space<vmem>> -> memref<1x10x18x128xf32, #tpu.memory_space<vmem>>
    %16 = tpu.memref_squeeze %15 : memref<1x10x18x128xf32, #tpu.memory_space<vmem>> -> memref<10x18x128xf32, #tpu.memory_space<vmem>>
    %17 = tpu.memref_slice %arg7[%9] : memref<2x!tpu.dma_semaphore, #tpu.memory_space<semaphore_mem>> -> memref<1x!tpu.dma_semaphore, #tpu.memory_space<semaphore_mem>>
    %18 = tpu.memref_squeeze %17 : memref<1x!tpu.dma_semaphore, #tpu.memory_space<semaphore_mem>> -> memref<!tpu.dma_semaphore, #tpu.memory_space<semaphore_mem>>
    tpu.wait_dma2 semaphore(%18 : memref<!tpu.dma_semaphore, #tpu.memory_space<semaphore_mem>>) src(%14 : memref<10x18x128xf32, #tpu.memory_space<any>>) dst(%16 : memref<10x18x128xf32, #tpu.memory_space<vmem>>)
    %c1_i32_11 = arith.constant 1 : i32
    %19 = arith.addi %arg1, %c1_i32_11 : i32
    %c2_i32_12 = arith.constant 2 : i32
    %20 = arith.cmpi slt, %19, %c2_i32_12 : i32
    %21 = arith.extui %20 : i1 to i32
    %c0_i32_13 = arith.constant 0 : i32
    %22 = arith.cmpi ne, %21, %c0_i32_13 : i32
    scf.if %22 {
      %c1_i32_54 = arith.constant 1 : i32
      %97 = arith.addi %arg1, %c1_i32_54 : i32
      %c1_i32_55 = arith.constant 1 : i32
      %98 = arith.subi %c1_i32_55, %9 : i32
      %c8_i32 = arith.constant 8 : i32
      %99 = arith.muli %97, %c8_i32 : i32
      %c0_i32_56 = arith.constant 0 : i32
      %c0_i32_57 = arith.constant 0 : i32
      %100 = tpu.memref_slice %arg2[%arg0, %99, %c0_i32_56, %c0_i32_57] : memref<2x18x18x128xf32, #tpu.memory_space<any>> -> memref<1x10x18x128xf32, #tpu.memory_space<any>>
      %101 = tpu.memref_squeeze %100 : memref<1x10x18x128xf32, #tpu.memory_space<any>> -> memref<10x18x128xf32, #tpu.memory_space<any>>
      %c0_i32_58 = arith.constant 0 : i32
      %c0_i32_59 = arith.constant 0 : i32
      %c0_i32_60 = arith.constant 0 : i32
      %102 = tpu.memref_slice %arg6[%98, %c0_i32_58, %c0_i32_59, %c0_i32_60] : memref<2x10x18x128xf32, #tpu.memory_space<vmem>> -> memref<1x10x18x128xf32, #tpu.memory_space<vmem>>
      %103 = tpu.memref_squeeze %102 : memref<1x10x18x128xf32, #tpu.memory_space<vmem>> -> memref<10x18x128xf32, #tpu.memory_space<vmem>>
      %104 = tpu.memref_slice %arg7[%98] : memref<2x!tpu.dma_semaphore, #tpu.memory_space<semaphore_mem>> -> memref<1x!tpu.dma_semaphore, #tpu.memory_space<semaphore_mem>>
      %105 = tpu.memref_squeeze %104 : memref<1x!tpu.dma_semaphore, #tpu.memory_space<semaphore_mem>> -> memref<!tpu.dma_semaphore, #tpu.memory_space<semaphore_mem>>
      tpu.enqueue_dma source(%101 : memref<10x18x128xf32, #tpu.memory_space<any>>) target(%103 : memref<10x18x128xf32, #tpu.memory_space<vmem>>) target_semaphore(%105 : memref<!tpu.dma_semaphore, #tpu.memory_space<semaphore_mem>>)
    } else {
    }
    %23 = arith.index_cast %9 : i32 to index
    %c0 = arith.constant 0 : index
    %c0_14 = arith.constant 0 : index
    %c0_15 = arith.constant 0 : index
    %24 = vector.load %arg6[%23, %c0, %c0_14, %c0_15] : memref<2x10x18x128xf32, #tpu.memory_space<vmem>>, vector<1x10x18x128xf32>
    %25 = vector.shape_cast %24 : vector<1x10x18x128xf32> to vector<10x18x128xf32>
    %cst = arith.constant 0.000000e+00 : f32
    %26 = vector.broadcast %cst : f32 to vector<128x128xf32>
    %27 = vector.extract_strided_slice %25 {offsets = [0, 0, 0], sizes = [8, 16, 128], strides = [1, 1, 1]} : vector<10x18x128xf32> to vector<8x16x128xf32>
    %28 = vector.shape_cast %27 : vector<8x16x128xf32> to vector<128x128xf32>
    %c0_16 = arith.constant 0 : index
    %c0_17 = arith.constant 0 : index
    %c0_18 = arith.constant 0 : index
    %29 = vector.load %arg3[%c0_16, %c0_17, %c0_18] : memref<9x128x128xf32, #tpu.memory_space<vmem>>, vector<1x128x128xf32>
    %30 = vector.shape_cast %29 : vector<1x128x128xf32> to vector<128x128xf32>
    %cst_19 = arith.constant dense<0.000000e+00> : vector<128x128xf32>
    %31 = tpu.matmul %28, %30, %cst_19 {dimension_numbers = #tpu.dot_dimension_numbers<[1], [0], [0], [1], [0, 0, 1, 1], [], []>} : vector<128x128xf32>, vector<128x128xf32>, vector<128x128xf32> -> vector<128x128xf32>
    %32 = arith.addf %26, %31 : vector<128x128xf32>
    %33 = vector.extract_strided_slice %25 {offsets = [0, 1, 0], sizes = [8, 16, 128], strides = [1, 1, 1]} : vector<10x18x128xf32> to vector<8x16x128xf32>
    %34 = vector.shape_cast %33 : vector<8x16x128xf32> to vector<128x128xf32>
    %c1 = arith.constant 1 : index
    %c0_20 = arith.constant 0 : index
    %c0_21 = arith.constant 0 : index
    %35 = vector.load %arg3[%c1, %c0_20, %c0_21] : memref<9x128x128xf32, #tpu.memory_space<vmem>>, vector<1x128x128xf32>
    %36 = vector.shape_cast %35 : vector<1x128x128xf32> to vector<128x128xf32>
    %cst_22 = arith.constant dense<0.000000e+00> : vector<128x128xf32>
    %37 = tpu.matmul %34, %36, %cst_22 {dimension_numbers = #tpu.dot_dimension_numbers<[1], [0], [0], [1], [0, 0, 1, 1], [], []>} : vector<128x128xf32>, vector<128x128xf32>, vector<128x128xf32> -> vector<128x128xf32>
    %38 = arith.addf %32, %37 : vector<128x128xf32>
    %39 = vector.extract_strided_slice %25 {offsets = [0, 2, 0], sizes = [8, 16, 128], strides = [1, 1, 1]} : vector<10x18x128xf32> to vector<8x16x128xf32>
    %40 = vector.shape_cast %39 : vector<8x16x128xf32> to vector<128x128xf32>
    %c2 = arith.constant 2 : index
    %c0_23 = arith.constant 0 : index
    %c0_24 = arith.constant 0 : index
    %41 = vector.load %arg3[%c2, %c0_23, %c0_24] : memref<9x128x128xf32, #tpu.memory_space<vmem>>, vector<1x128x128xf32>
    %42 = vector.shape_cast %41 : vector<1x128x128xf32> to vector<128x128xf32>
    %cst_25 = arith.constant dense<0.000000e+00> : vector<128x128xf32>
    %43 = tpu.matmul %40, %42, %cst_25 {dimension_numbers = #tpu.dot_dimension_numbers<[1], [0], [0], [1], [0, 0, 1, 1], [], []>} : vector<128x128xf32>, vector<128x128xf32>, vector<128x128xf32> -> vector<128x128xf32>
    %44 = arith.addf %38, %43 : vector<128x128xf32>
    %45 = vector.extract_strided_slice %25 {offsets = [1, 0, 0], sizes = [8, 16, 128], strides = [1, 1, 1]} : vector<10x18x128xf32> to vector<8x16x128xf32>
    %46 = vector.shape_cast %45 : vector<8x16x128xf32> to vector<128x128xf32>
    %c3 = arith.constant 3 : index
    %c0_26 = arith.constant 0 : index
    %c0_27 = arith.constant 0 : index
    %47 = vector.load %arg3[%c3, %c0_26, %c0_27] : memref<9x128x128xf32, #tpu.memory_space<vmem>>, vector<1x128x128xf32>
    %48 = vector.shape_cast %47 : vector<1x128x128xf32> to vector<128x128xf32>
    %cst_28 = arith.constant dense<0.000000e+00> : vector<128x128xf32>
    %49 = tpu.matmul %46, %48, %cst_28 {dimension_numbers = #tpu.dot_dimension_numbers<[1], [0], [0], [1], [0, 0, 1, 1], [], []>} : vector<128x128xf32>, vector<128x128xf32>, vector<128x128xf32> -> vector<128x128xf32>
    %50 = arith.addf %44, %49 : vector<128x128xf32>
    %51 = vector.extract_strided_slice %25 {offsets = [1, 1, 0], sizes = [8, 16, 128], strides = [1, 1, 1]} : vector<10x18x128xf32> to vector<8x16x128xf32>
    %52 = vector.shape_cast %51 : vector<8x16x128xf32> to vector<128x128xf32>
    %c4 = arith.constant 4 : index
    %c0_29 = arith.constant 0 : index
    %c0_30 = arith.constant 0 : index
    %53 = vector.load %arg3[%c4, %c0_29, %c0_30] : memref<9x128x128xf32, #tpu.memory_space<vmem>>, vector<1x128x128xf32>
    %54 = vector.shape_cast %53 : vector<1x128x128xf32> to vector<128x128xf32>
    %cst_31 = arith.constant dense<0.000000e+00> : vector<128x128xf32>
    %55 = tpu.matmul %52, %54, %cst_31 {dimension_numbers = #tpu.dot_dimension_numbers<[1], [0], [0], [1], [0, 0, 1, 1], [], []>} : vector<128x128xf32>, vector<128x128xf32>, vector<128x128xf32> -> vector<128x128xf32>
    %56 = arith.addf %50, %55 : vector<128x128xf32>
    %57 = vector.extract_strided_slice %25 {offsets = [1, 2, 0], sizes = [8, 16, 128], strides = [1, 1, 1]} : vector<10x18x128xf32> to vector<8x16x128xf32>
    %58 = vector.shape_cast %57 : vector<8x16x128xf32> to vector<128x128xf32>
    %c5 = arith.constant 5 : index
    %c0_32 = arith.constant 0 : index
    %c0_33 = arith.constant 0 : index
    %59 = vector.load %arg3[%c5, %c0_32, %c0_33] : memref<9x128x128xf32, #tpu.memory_space<vmem>>, vector<1x128x128xf32>
    %60 = vector.shape_cast %59 : vector<1x128x128xf32> to vector<128x128xf32>
    %cst_34 = arith.constant dense<0.000000e+00> : vector<128x128xf32>
    %61 = tpu.matmul %58, %60, %cst_34 {dimension_numbers = #tpu.dot_dimension_numbers<[1], [0], [0], [1], [0, 0, 1, 1], [], []>} : vector<128x128xf32>, vector<128x128xf32>, vector<128x128xf32> -> vector<128x128xf32>
    %62 = arith.addf %56, %61 : vector<128x128xf32>
    %63 = vector.extract_strided_slice %25 {offsets = [2, 0, 0], sizes = [8, 16, 128], strides = [1, 1, 1]} : vector<10x18x128xf32> to vector<8x16x128xf32>
    %64 = vector.shape_cast %63 : vector<8x16x128xf32> to vector<128x128xf32>
    %c6 = arith.constant 6 : index
    %c0_35 = arith.constant 0 : index
    %c0_36 = arith.constant 0 : index
    %65 = vector.load %arg3[%c6, %c0_35, %c0_36] : memref<9x128x128xf32, #tpu.memory_space<vmem>>, vector<1x128x128xf32>
    %66 = vector.shape_cast %65 : vector<1x128x128xf32> to vector<128x128xf32>
    %cst_37 = arith.constant dense<0.000000e+00> : vector<128x128xf32>
    %67 = tpu.matmul %64, %66, %cst_37 {dimension_numbers = #tpu.dot_dimension_numbers<[1], [0], [0], [1], [0, 0, 1, 1], [], []>} : vector<128x128xf32>, vector<128x128xf32>, vector<128x128xf32> -> vector<128x128xf32>
    %68 = arith.addf %62, %67 : vector<128x128xf32>
    %69 = vector.extract_strided_slice %25 {offsets = [2, 1, 0], sizes = [8, 16, 128], strides = [1, 1, 1]} : vector<10x18x128xf32> to vector<8x16x128xf32>
    %70 = vector.shape_cast %69 : vector<8x16x128xf32> to vector<128x128xf32>
    %c7 = arith.constant 7 : index
    %c0_38 = arith.constant 0 : index
    %c0_39 = arith.constant 0 : index
    %71 = vector.load %arg3[%c7, %c0_38, %c0_39] : memref<9x128x128xf32, #tpu.memory_space<vmem>>, vector<1x128x128xf32>
    %72 = vector.shape_cast %71 : vector<1x128x128xf32> to vector<128x128xf32>
    %cst_40 = arith.constant dense<0.000000e+00> : vector<128x128xf32>
    %73 = tpu.matmul %70, %72, %cst_40 {dimension_numbers = #tpu.dot_dimension_numbers<[1], [0], [0], [1], [0, 0, 1, 1], [], []>} : vector<128x128xf32>, vector<128x128xf32>, vector<128x128xf32> -> vector<128x128xf32>
    %74 = arith.addf %68, %73 : vector<128x128xf32>
    %75 = vector.extract_strided_slice %25 {offsets = [2, 2, 0], sizes = [8, 16, 128], strides = [1, 1, 1]} : vector<10x18x128xf32> to vector<8x16x128xf32>
    %76 = vector.shape_cast %75 : vector<8x16x128xf32> to vector<128x128xf32>
    %c8 = arith.constant 8 : index
    %c0_41 = arith.constant 0 : index
    %c0_42 = arith.constant 0 : index
    %77 = vector.load %arg3[%c8, %c0_41, %c0_42] : memref<9x128x128xf32, #tpu.memory_space<vmem>>, vector<1x128x128xf32>
    %78 = vector.shape_cast %77 : vector<1x128x128xf32> to vector<128x128xf32>
    %cst_43 = arith.constant dense<0.000000e+00> : vector<128x128xf32>
    %79 = tpu.matmul %76, %78, %cst_43 {dimension_numbers = #tpu.dot_dimension_numbers<[1], [0], [0], [1], [0, 0, 1, 1], [], []>} : vector<128x128xf32>, vector<128x128xf32>, vector<128x128xf32> -> vector<128x128xf32>
    %80 = arith.addf %74, %79 : vector<128x128xf32>
    %c0_44 = arith.constant 0 : index
    %c0_45 = arith.constant 0 : index
    %81 = vector.load %arg4[%c0_44, %c0_45] : memref<1x128xf32, #tpu.memory_space<vmem>>, vector<1x128xf32>
    %82 = vector.broadcast %81 : vector<1x128xf32> to vector<128x128xf32>
    %83 = arith.addf %80, %82 : vector<128x128xf32>
    %cst_46 = arith.constant 3.000000e+00 : f32
    %84 = vector.broadcast %cst_46 : f32 to vector<128x128xf32>
    %85 = arith.addf %83, %84 : vector<128x128xf32>
    %cst_47 = arith.constant 0.000000e+00 : f32
    %cst_48 = arith.constant 6.000000e+00 : f32
    %86 = vector.broadcast %cst_47 : f32 to vector<128x128xf32>
    %87 = arith.maximumf %86, %85 : vector<128x128xf32>
    %88 = vector.broadcast %cst_48 : f32 to vector<128x128xf32>
    %89 = arith.minimumf %88, %87 : vector<128x128xf32>
    %90 = arith.mulf %83, %89 : vector<128x128xf32>
    %cst_49 = arith.constant 0.166666672 : f32
    %91 = vector.broadcast %cst_49 : f32 to vector<128x128xf32>
    %92 = arith.mulf %90, %91 : vector<128x128xf32>
    %93 = vector.shape_cast %92 : vector<128x128xf32> to vector<8x16x128xf32>
    %c0_50 = arith.constant 0 : index
    %c0_51 = arith.constant 0 : index
    %c0_52 = arith.constant 0 : index
    %c0_53 = arith.constant 0 : index
    %94 = vector.load %arg5[%c0_50, %c0_51, %c0_52, %c0_53] : memref<1x8x16x128xf32, #tpu.memory_space<vmem>>, vector<1x8x16x128xf32>
    %95 = vector.shape_cast %94 : vector<1x8x16x128xf32> to vector<8x16x128xf32>
    %96 = vector.shape_cast %93 : vector<8x16x128xf32> to vector<1x8x16x128xf32>
    tpu.vector_store %arg5[%c0_50, %c0_51, %c0_52, %c0_53], %96 {strides = array<i32>} : memref<1x8x16x128xf32, #tpu.memory_space<vmem>>, vector<1x8x16x128xf32>,
    return
  }
  func.func @transform_1(%arg0: i32, %arg1: i32) -> (i32, i32, i32) {
    %c0_i32 = arith.constant 0 : i32
    %c0_i32_0 = arith.constant 0 : i32
    %c0_i32_1 = arith.constant 0 : i32
    %c0_i32_2 = arith.constant 0 : i32
    return %c0_i32, %c0_i32_0, %c0_i32_1 : i32, i32, i32
  }
  func.func @transform_2(%arg0: i32, %arg1: i32) -> (i32, i32) {
    %c0_i32 = arith.constant 0 : i32
    %c0_i32_0 = arith.constant 0 : i32
    %c0_i32_1 = arith.constant 0 : i32
    return %c0_i32, %c0_i32_0 : i32, i32
  }
  func.func @transform_3(%arg0: i32, %arg1: i32) -> (i32, i32, i32, i32) {
    %c0_i32 = arith.constant 0 : i32
    %c0_i32_0 = arith.constant 0 : i32
    %c0_i32_1 = arith.constant 0 : i32
    return %arg0, %arg1, %c0_i32, %c0_i32_0 : i32, i32, i32, i32
  }
}

</mosaic_0001>

<bundles_post_ra>
// kernel: tpu_custom_call.1
= control target key start
LH: loop header
LB: loop body
LE: loop exit
PB: predicated region body
PF: predicated region fallthrough
CT: control target
= control target key end

     0   :  { %8 = vsyncpa [#allocation5], 0  ;;  %s5237_s0 = inlined_call_operand.vmem [shape: f32[2,18,18,128], index: 0, kind: input, shape index: {}]   ;;  %s5238_s1 = inlined_call_operand.vmem [shape: f32[9,128,128], index: 1, kind: input, shape index: {}]   ;;  %s5239_s2 = inlined_call_operand.vmem [shape: f32[1,128], index: 2, kind: input, shape index: {}]   ;;  %s5240_s3 = inlined_call_operand.hbm [shape: f32[2,16,16,128], index: 3, kind: output, shape index: {}]  }
   0x1   :  { %10 = vsyncpa [#allocation5 + $0x1], 0  ;;  %s4087_s12 = smov 0   ;;  %s4089_s13 = smov 0  }
   0x2   :  { %s4091_s14 = smov 0   ;;  %s4093_s15 = smov 0  }
   0x3   :  { %s4095_s16 = smov 0   ;;  %s4097_s17 = smov 0  }
   0x4   :  { %s4099_s18 = smov 0   ;;  %s4101_s19 = smov 0  }
   0x5 LB: > { %s2459_s20 = sadd.s32 4294967295, %s4062_s19   ;;  %s2460_s21 = sadd.s32 4294967294, %s4062_s19   ;;  %s4062_s19 = sphi %s4101_s19, %s16_s19   ;;  %s4058_s18 = sphi %s4099_s18, %s5251_s18   ;;  %s4054_s17 = sphi %s4097_s17, %s5250_s17   ;;  %s4050_s16 = sphi %s4095_s16, %s5249_s16   ;;  %s4046_s15 = sphi %s4093_s15, %s5248_s15   ;;  %s4042_s14 = sphi %s4091_s14, %s5247_s14   ;;  %s4038_s13 = sphi %s4089_s13, %s5246_s13   ;;  %s4034_s12 = sphi %s4087_s12, %s5245_s12  }
   0x6   : > { %s25_s22 = sadd.s32 1, %s4054_s17  ;;  %s28_s23 = sadd.s32 1, %s4058_s18 }
   0x7   : > { %p26_p0 = scmp.ge.s32.totalorder %s25_s22, 2  ;;  %p89_p1 = scmp.ne.s32.totalorder %s4042_s14, %s4038_s13 }
   0x8   : > { %p90_p2 = scmp.eq.s32.totalorder %s2459_s20, 3  ;;  %p95_p5 = scmp.ne.s32.totalorder %s4038_s13, %s4034_s12 }
   0x9   : > { %s5253_s22 = smov (%p26_p0, %s25_s22), 0  ;;  %s5255_s23 = smov (!%p26_p0, %s28_s23), %s4058_s18 }
   0xa   : > { %s75_s24 = ssub.s32 %s4054_s17, %s5253_s22  ;;  %p4138_p3 = por %p90_p2, %p89_p1 }
   0xb   : > { %p30_p4 = scmp.ge.s32.totalorder %s5255_s23, 2  ;;  %p96_p6 = scmp.eq.s32.totalorder %s2460_s21, 3 }
   0xc   : > { %p2462_p7 = scmp.ge.s32.totalorder %s4062_s19, 1  ;;  %p120_p9 = scmp.lt.s32.totalorder %s4062_s19, 5 }
   0xd   : > { %s5257_s23 = smov (%p30_p4, %s5255_s23), 0  ;;  %p4147_p8 = por %p96_p6, %p95_p5 }
   0xe   : > { %s74_s27 = ssub.s32 %s4058_s18, %s5257_s23  ;;  %s79_s28 = sadd.s32 1, %s4042_s14 }
   0xf   : > { %s76_s29 = sor.u32 %s75_s24, %s74_s27  ;;  %p121_p10 = pnand %p2462_p7, %p120_p9 }
  0x10   : > { %p77_p11 = scmp.eq.s32.totalorder %s76_s29, 0  ;;  %s5241_s4 = sand.u32 (!%p121_p10), 1, %s4038_s13  }
  0x11   : > { %124 = sbr.rel (%p121_p10) target bundleno = 501 (0x1f5), region = 28  ;;  %p138_p12 = scmp.lt.s32.totalorder (!%p121_p10), %s4046_s15, 0 }
  0x12   : > { %s4156_s30 = scalar_select %p77_p11, %s4042_s14, %s79_s28  }
  0x13   : > { %s2463_s5 = sshll.u32 (!%p121_p10), %s5241_s4, 7  ;;  %s139_s6 = ssub.s32 (!%p121_p10), 0, %s4046_s15 }
  0x14   : > { %s2464_s7 = smin.u32 (!%p121_p10), %s4046_s15, %s139_s6  ;;  %s4166_s11 = scalar_lea.vmem (!%p121_p10), [#allocation4], %s2463_s5 }
  0x15   : > { %s141_s8 = sand.u32 (!%p121_p10), 1, %s2464_s7   ;;  %p2467_p0 = scmp.ne.s32.totalorder (!%p121_p10), %s4046_s15, 0 }
  0x16   : > { %s142_s9 = ssub.s32 (!%p121_p10), 0, %s141_s8 }
  0x18   : > { %s5259_s9 = smov (!%p138_p12, %s142_s9), %s141_s8  ;;  %153 = sbr.rel (%p2467_p0) target bundleno = 47 (0x2f), region = 32 }
  0x19   : > { %p2466_p13 = scmp.lt.s32.totalorder %s5259_s9, 0  ;;  %s148_s10 = sadd.s32 2, %s5259_s9 }
  0x1a   : > { %s154_s20 = smul.u32 (!%p2467_p0), 432, %s4050_s16 }
  0x1b   : > { %s5261_s10 = smov (!%p2466_p13, %s148_s10), %s5259_s9 }
  0x1c   : > { %s4173_s27 = scalar_lea.vmem (!%p2467_p0), %s5237_s0, %s154_s20 }
  0x1d   : > { %v211_v0 = vld [vmem:[%s4173_s27] sm:$0xff] (!%p2467_p0)  ;;  %v213_v1 = vld [vmem:[%s4173_s27 + $0x8] sm:$0xff] (!%p2467_p0)  ;;  %v215_v2 = vld [vmem:[%s4173_s27 + $0x18] sm:$0xff] (!%p2467_p0) }
  0x1e   : > { %212 = vst [vmem:[#allocation2] sm:$0xff] (!%p2467_p0), %v211_v0  ;;  %214 = vst [vmem:[#allocation2 + $0x8] sm:$0xff] (!%p2467_p0), %v213_v1  ;;  %v217_v3 = vld [vmem:[%s4173_s27 + $0x20] sm:$0xff] (!%p2467_p0)  ;;  %v219_v4 = vld [vmem:[%s4173_s27 + $0x30] sm:$0xff] (!%p2467_p0) }
  0x1f   : > { %216 = vst [vmem:[#allocation2 + $0x18] sm:$0xff] %v215_v2  ;;  %v221_v5 = vld [vmem:[%s4173_s27 + $0x38] sm:$0xff]  ;;  %218 = vst [vmem:[#allocation2 + $0x20] sm:$0xff] %v217_v3  ;;  %v223_v6 = vld [vmem:[%s4173_s27 + $0x48] sm:$0xff] }
  0x20   : > { %220 = vst [vmem:[#allocation2 + $0x30] sm:$0xff] %v219_v4  ;;  %222 = vst [vmem:[#allocation2 + $0x38] sm:$0xff] %v221_v5  ;;  %v225_v7 = vld [vmem:[%s4173_s27 + $0x50] sm:$0xff]  ;;  %v227_v8 = vld [vmem:[%s4173_s27 + $0x60] sm:$0xff] }
  0x21   : > { %224 = vst [vmem:[#allocation2 + $0x48] sm:$0xff] %v223_v6  ;;  %226 = vst [vmem:[#allocation2 + $0x50] sm:$0xff] %v225_v7  ;;  %v229_v9 = vld [vmem:[%s4173_s27 + $0x68] sm:$0xff]  ;;  %v231_v10 = vld [vmem:[%s4173_s27 + $0x78] sm:$0xff] }
  0x22   : > { %228 = vst [vmem:[#allocation2 + $0x60] sm:$0xff] %v227_v8  ;;  %v233_v11 = vld [vmem:[%s4173_s27 + $0x80] sm:$0xff]  ;;  %230 = vst [vmem:[#allocation2 + $0x68] sm:$0xff] %v229_v9  ;;  %v235_v12 = vld [vmem:[%s4173_s27 + $0x90] sm:$0xff] }
  0x23   : > { %232 = vst [vmem:[#allocation2 + $0x78] sm:$0xff] %v231_v10  ;;  %234 = vst [vmem:[#allocation2 + $0x80] sm:$0xff] %v233_v11  ;;  %v237_v13 = vld [vmem:[%s4173_s27 + $0x98] sm:$0xff]  ;;  %v239_v14 = vld [vmem:[%s4173_s27 + $0xa8] sm:$0xff] }
  0x24   : > { %236 = vst [vmem:[#allocation2 + $0x90] sm:$0xff] %v235_v12  ;;  %238 = vst [vmem:[#allocation2 + $0x98] sm:$0xff] %v237_v13  ;;  %v241_v15 = vld [vmem:[%s4173_s27 + $0xb0] sm:$0xff]  ;;  %v243_v16 = vld [vmem:[%s4173_s27 + $0xc0] sm:$0xff] }
  0x25   : > { %240 = vst [vmem:[#allocation2 + $0xa8] sm:$0xff] %v239_v14  ;;  %v245_v17 = vld [vmem:[%s4173_s27 + $0xc8] sm:$0xff]  ;;  %242 = vst [vmem:[#allocation2 + $0xb0] sm:$0xff] %v241_v15  ;;  %v247_v18 = vld [vmem:[%s4173_s27 + $0xd8] sm:$0xff] }
  0x26   : > { %244 = vst [vmem:[#allocation2 + $0xc0] sm:$0xff] %v243_v16  ;;  %246 = vst [vmem:[#allocation2 + $0xc8] sm:$0xff] %v245_v17  ;;  %v249_v19 = vld [vmem:[%s4173_s27 + $0xe0] sm:$0xff]  ;;  %v2468_v20 = vld [vmem:[%s4173_s27 + $0x10] sm:$0x3] }
  0x27   : > { %248 = vst [vmem:[#allocation2 + $0xd8] sm:$0xff] %v247_v18  ;;  %250 = vst [vmem:[#allocation2 + $0xe0] sm:$0xff] %v249_v19  ;;  %v2469_v21 = vld [vmem:[%s4173_s27 + $0x28] sm:$0x3]  ;;  %v2470_v22 = vld [vmem:[%s4173_s27 + $0x40] sm:$0x3] }
  0x28   : > { %261 = vst [vmem:[#allocation2 + $0x10] sm:$0x3] %v2468_v20  ;;  %v2471_v23 = vld [vmem:[%s4173_s27 + $0x58] sm:$0x3]  ;;  %263 = vst [vmem:[#allocation2 + $0x28] sm:$0x3] %v2469_v21 }
  0x29   : > { %265 = vst [vmem:[#allocation2 + $0x40] sm:$0x3] %v2470_v22  ;;  %267 = vst [vmem:[#allocation2 + $0x58] sm:$0x3] %v2471_v23  ;;  %v2472_v24 = vld [vmem:[%s4173_s27 + $0x70] sm:$0x3] }
  0x2a   : > { %v2473_v25 = vld [vmem:[%s4173_s27 + $0x88] sm:$0x3]  ;;  %v2474_v26 = vld [vmem:[%s4173_s27 + $0xa0] sm:$0x3]  ;;  %269 = vst [vmem:[#allocation2 + $0x70] sm:$0x3] %v2472_v24 }
  0x2b   : > { %271 = vst [vmem:[#allocation2 + $0x88] sm:$0x3] %v2473_v25  ;;  %273 = vst [vmem:[#allocation2 + $0xa0] sm:$0x3] %v2474_v26  ;;  %v2475_v27 = vld [vmem:[%s4173_s27 + $0xb8] sm:$0x3] }
  0x2c   : > { %v2476_v28 = vld [vmem:[%s4173_s27 + $0xd0] sm:$0x3]  ;;  %v2477_v29 = vld [vmem:[%s4173_s27 + $0xe8] sm:$0x3]  ;;  %275 = vst [vmem:[#allocation2 + $0xb8] sm:$0x3] %v2475_v27 }
  0x2d   : > { %277 = vst [vmem:[#allocation2 + $0xd0] sm:$0x3] %v2476_v28  ;;  %279 = vst [vmem:[#allocation2 + $0xe8] sm:$0x3] %v2477_v29 }
  0x2e   : > { %283 = vsyncadd [#allocation3], 2880 }
  0x2f PF: > { %s284_s28 = smul.u32 240, %s5261_s10  ;;  %s286_s5 = scalar_lea.sflag [#allocation3], %s5261_s10 }
  0x31   : > { %s4206_s29 = scalar_lea.vmem [#allocation2], %s284_s28 }
  0x32   : > { %4026 = dma.done.wait %s286_s5, 2880 }
  0x33   : > { %4027 = vsyncadd %s286_s5, 4294964416  ;;  %s291_s6 = sadd.s32 1, %s4046_s15 }
  0x34   : > { %p2478_p1 = scmp.ge.s32.totalorder %s291_s6, 2 }
  0x35   : > { %s296_s7 = ssub.s32 (!%p2478_p1), 1, %s5261_s10  ;;  %s2387_s8 = smul.u32 (!%p2478_p1), 192, %s4046_s15 }
  0x36   : > { %295 = sbr.rel (%p2478_p1) target bundleno = 77 (0x4d), region = 73  ;;  %s304_s6 = scalar_lea.sflag (!%p2478_p1), [#allocation3], %s296_s7 }
  0x37   : > { %s2388_s9 = smul.u32 (!%p2478_p1), 432, %s4050_s16 }
  0x38   : > { %s302_s20 = smul.u32 (!%p2478_p1), 240, %s296_s7 }
  0x39   : > { %s2389_s21 = sadd.s32 (!%p2478_p1), %s2388_s9, %s2387_s8 }
  0x3a   : > { %s4218_s28 = scalar_lea.vmem (!%p2478_p1), %s5237_s0, %s2389_s21  ;;  %s4223_s5 = scalar_lea.vmem (!%p2478_p1), [#allocation2], %s302_s20 }
  0x3b   : > { %v2480_v30 = vld [vmem:[%s4218_s28 + $0xc0] sm:$0xff] (!%p2478_p1)  ;;  %v2481_v31 = vld [vmem:[%s4218_s28 + $0xc8] sm:$0xff] (!%p2478_p1)  ;;  %v2482_v32 = vld [vmem:[%s4218_s28 + $0xd8] sm:$0xff] (!%p2478_p1) }
  0x3c   : > { %361 = vst [vmem:[%s4223_s5] sm:$0xff] (!%p2478_p1), %v2480_v30  ;;  %363 = vst [vmem:[%s4223_s5 + $0x8] sm:$0xff] (!%p2478_p1), %v2481_v31  ;;  %v2483_v33 = vld [vmem:[%s4218_s28 + $0xe0] sm:$0xff] (!%p2478_p1)  ;;  %v2484_v34 = vld [vmem:[%s4218_s28 + $0xf0] sm:$0xff] (!%p2478_p1) }
  0x3d   : > { %365 = vst [vmem:[%s4223_s5 + $0x18] sm:$0xff] %v2482_v32  ;;  %v2485_v35 = vld [vmem:[%s4218_s28 + $0xf8] sm:$0xff]  ;;  %367 = vst [vmem:[%s4223_s5 + $0x20] sm:$0xff] %v2483_v33  ;;  %v2486_v36 = vld [vmem:[%s4218_s28 + $0x108] sm:$0xff] }
  0x3e   : > { %369 = vst [vmem:[%s4223_s5 + $0x30] sm:$0xff] %v2484_v34  ;;  %371 = vst [vmem:[%s4223_s5 + $0x38] sm:$0xff] %v2485_v35  ;;  %v2487_v37 = vld [vmem:[%s4218_s28 + $0x110] sm:$0xff]  ;;  %v2488_v38 = vld [vmem:[%s4218_s28 + $0x120] sm:$0xff] }
  0x3f   : > { %373 = vst [vmem:[%s4223_s5 + $0x48] sm:$0xff] %v2486_v36  ;;  %375 = vst [vmem:[%s4223_s5 + $0x50] sm:$0xff] %v2487_v37  ;;  %v2489_v39 = vld [vmem:[%s4218_s28 + $0x128] sm:$0xff]  ;;  %v2490_v40 = vld [vmem:[%s4218_s28 + $0x138] sm:$0xff] }
  0x40   : > { %377 = vst [vmem:[%s4223_s5 + $0x60] sm:$0xff] %v2488_v38  ;;  %v2491_v41 = vld [vmem:[%s4218_s28 + $0x140] sm:$0xff]  ;;  %379 = vst [vmem:[%s4223_s5 + $0x68] sm:$0xff] %v2489_v39  ;;  %v2492_v42 = vld [vmem:[%s4218_s28 + $0x150] sm:$0xff] }
  0x41   : > { %381 = vst [vmem:[%s4223_s5 + $0x78] sm:$0xff] %v2490_v40  ;;  %383 = vst [vmem:[%s4223_s5 + $0x80] sm:$0xff] %v2491_v41  ;;  %v2493_v43 = vld [vmem:[%s4218_s28 + $0x158] sm:$0xff]  ;;  %v2494_v44 = vld [vmem:[%s4218_s28 + $0x168] sm:$0xff] }
  0x42   : > { %385 = vst [vmem:[%s4223_s5 + $0x90] sm:$0xff] %v2492_v42  ;;  %387 = vst [vmem:[%s4223_s5 + $0x98] sm:$0xff] %v2493_v43  ;;  %v2495_v45 = vld [vmem:[%s4218_s28 + $0x170] sm:$0xff]  ;;  %v2496_v46 = vld [vmem:[%s4218_s28 + $0x180] sm:$0xff] }
  0x43   : > { %389 = vst [vmem:[%s4223_s5 + $0xa8] sm:$0xff] %v2494_v44  ;;  %v2497_v47 = vld [vmem:[%s4218_s28 + $0x188] sm:$0xff]  ;;  %391 = vst [vmem:[%s4223_s5 + $0xb0] sm:$0xff] %v2495_v45  ;;  %v2498_v48 = vld [vmem:[%s4218_s28 + $0x198] sm:$0xff] }
  0x44   : > { %393 = vst [vmem:[%s4223_s5 + $0xc0] sm:$0xff] %v2496_v46  ;;  %395 = vst [vmem:[%s4223_s5 + $0xc8] sm:$0xff] %v2497_v47  ;;  %v2499_v49 = vld [vmem:[%s4218_s28 + $0x1a0] sm:$0xff]  ;;  %v2500_v50 = vld [vmem:[%s4218_s28 + $0xd0] sm:$0x3] }
  0x45   : > { %397 = vst [vmem:[%s4223_s5 + $0xd8] sm:$0xff] %v2498_v48  ;;  %399 = vst [vmem:[%s4223_s5 + $0xe0] sm:$0xff] %v2499_v49  ;;  %v2502_v51 = vld [vmem:[%s4218_s28 + $0xe8] sm:$0x3]  ;;  %v2504_v52 = vld [vmem:[%s4218_s28 + $0x100] sm:$0x3] }
  0x46   : > { %2501 = vst [vmem:[%s4223_s5 + $0x10] sm:$0x3] %v2500_v50  ;;  %v2506_v53 = vld [vmem:[%s4218_s28 + $0x118] sm:$0x3]  ;;  %2503 = vst [vmem:[%s4223_s5 + $0x28] sm:$0x3] %v2502_v51 }
  0x47   : > { %2505 = vst [vmem:[%s4223_s5 + $0x40] sm:$0x3] %v2504_v52  ;;  %2507 = vst [vmem:[%s4223_s5 + $0x58] sm:$0x3] %v2506_v53  ;;  %v2508_v54 = vld [vmem:[%s4218_s28 + $0x130] sm:$0x3] }
  0x48   : > { %v2510_v55 = vld [vmem:[%s4218_s28 + $0x148] sm:$0x3]  ;;  %v2512_v56 = vld [vmem:[%s4218_s28 + $0x160] sm:$0x3]  ;;  %2509 = vst [vmem:[%s4223_s5 + $0x70] sm:$0x3] %v2508_v54 }
  0x49   : > { %2511 = vst [vmem:[%s4223_s5 + $0x88] sm:$0x3] %v2510_v55  ;;  %2513 = vst [vmem:[%s4223_s5 + $0xa0] sm:$0x3] %v2512_v56  ;;  %v2514_v57 = vld [vmem:[%s4218_s28 + $0x178] sm:$0x3] }
  0x4a   : > { %v2516_v58 = vld [vmem:[%s4218_s28 + $0x190] sm:$0x3]  ;;  %v2518_v59 = vld [vmem:[%s4218_s28 + $0x1a8] sm:$0x3]  ;;  %2515 = vst [vmem:[%s4223_s5 + $0xb8] sm:$0x3] %v2514_v57 }
  0x4b   : > { %2517 = vst [vmem:[%s4223_s5 + $0xd0] sm:$0x3] %v2516_v58  ;;  %2519 = vst [vmem:[%s4223_s5 + $0xe8] sm:$0x3] %v2518_v59 }
  0x4c   : > { %432 = vsyncadd %s304_s6, 2880 }
  0x4d PF: > { %v2530_v60 = vld [vmem:[%s5238_s1 + $0x80] sm:$0xff]  ;;  %v2531_v61 = vld [vmem:[%s5238_s1 + $0x88] sm:$0xff]  ;;  %v2532_v1 = vld [vmem:[%s5238_s1 + $0x90] sm:$0xff]  ;;  %vm503_vm0 = vcmask 1046528   ;;  %vm867_vm1 = vcmask 1045504   ;;  %s2668_s9 = sshll.u32 %s4046_s15, 4 }
  0x4e   : > { %v2578_v62 = vld [vmem:[%s5238_s1 + $0x200] sm:$0xff]  ;;  %v3461_v63 = vpack.c.bf16 %v2531_v61, %v2530_v60  ;;  %v2579_v0 = vld [vmem:[%s5238_s1 + $0x208] sm:$0xff]  ;;  %v2533_v2 = vld [vmem:[%s5238_s1 + $0x98] sm:$0xff]  ;;  %s2662_s20 = sshll.u32 %s4050_s16, 5  ;;  %s2340_s16 = sshll.u32 %s4166_s11, 4  ;;  %s5177_s16 = int_to_ptr.vmem [resolvable:$true] %s2340_s16 }
  0x4f   : > { %v3589_v3 = vpack.c.bf16 %v2579_v0, %v2578_v62  ;;  %v3465_v4 = vpack.c.bf16 %v2533_v2, %v2532_v1  ;;  %v2580_v5 = vld [vmem:[%s5238_s1 + $0x210] sm:$0xff]  ;;  %v2581_v6 = vld [vmem:[%s5238_s1 + $0x218] sm:$0xff]  ;;  %v2534_v7 = vld [vmem:[%s5238_s1 + $0xa0] sm:$0xff]  ;;  %s2337_s21 = sadd.s32 %s2668_s9, %s2662_s20  ;;  %s5244_s28 = sand.u32 1, %s4038_s13  }
  0x50   : > { %3462 = vmatprep.subr.bf16.mxu1 %v3461_v63  ;;  %v3593_v8 = vpack.c.bf16 %v2581_v6, %v2580_v5  ;;  %v2535_v9 = vld [vmem:[%s5238_s1 + $0xa8] sm:$0xff]  ;;  %v2582_v10 = vld [vmem:[%s5238_s1 + $0x220] sm:$0xff]  ;;  %v2536_v14 = vld [vmem:[%s5238_s1 + $0xb0] sm:$0xff]  ;;  %s2663_s15 = sshll.u32 %s2337_s21, 7  ;;  %s5185_s10 = scalar_lea.sflag [#allocation5], %s5244_s28 }
  0x51   : > { %v2583_v11 = vld [vmem:[%s5238_s1 + $0x228] sm:$0xff]  ;;  %3590 = vmatprep.subr.bf16.mxu0 %v3589_v3  ;;  %3464 = vmatpush3.bf16.msra.mxu1 %v3461_v63  ;;  %v3469_v12 = vpack.c.bf16 %v2535_v9, %v2534_v7  ;;  %v2537_v15 = vld [vmem:[%s5238_s1 + $0xb8] sm:$0xff]  ;;  %v2584_v16 = vld [vmem:[%s5238_s1 + $0x230] sm:$0xff]  ;;  %s5175_s27 = scalar_lea.hbm %s5240_s3, %s2663_s15  ;;  %s3966_s7 = scalar_lea.vmem %s5177_s16, 2048 }
  0x52   : > { %3592 = vmatpush3.bf16.msra.mxu0 %v3589_v3  ;;  %3466 = vmatprep.subr.bf16.mxu1 %v3465_v4  ;;  %v3597_v13 = vpack.c.bf16 %v2583_v11, %v2582_v10  ;;  %v2585_v17 = vld [vmem:[%s5238_s1 + $0x238] sm:$0xff]  ;;  %v3473_v18 = vpack.c.bf16 %v2537_v15, %v2536_v14  ;;  %v2538_v19 = vld [vmem:[%s5238_s1 + $0xc0] sm:$0xff]  ;;  %v2539_v20 = vld [vmem:[%s5238_s1 + $0xc8] sm:$0xff]  ;;  %p3967_p2 = scmp.ne.s32.totalorder %s5177_s16, %s3966_s7  ;;  %s4064_s5 = smov [#allocation4]  }
  0x53   : > { %3594 = vmatprep.subr.bf16.mxu0 %v3593_v8  ;;  %v3601_v21 = vpack.c.bf16 %v2585_v17, %v2584_v16  ;;  %v2586_v22 = vld [vmem:[%s5238_s1 + $0x240] sm:$0xff]  ;;  %v2587_v23 = vld [vmem:[%s5238_s1 + $0x248] sm:$0xff]  ;;  %v3477_v32 = vpack.c.bf16 %v2539_v20, %v2538_v19  ;;  %v2540_v34 = vld [vmem:[%s5238_s1 + $0xd0] sm:$0xff]  ;;  %s3970_s6 = sshll.u32 %s4064_s5, 4  ;;  %s3971_s6 = int_to_ptr.vmem [resolvable:$false] %s3970_s6 }
  0x54   : > { %v4345_v24 = vld [vmem:[%s4206_s29] sm:$0xff]  ;;  %v4348_v25 = vld [vmem:[%s4206_s29 + $0x8] sm:$0xff]  ;;  %v4352_v27 = vld [vmem:[%s4206_s29 + $0x18] sm:$0xff]  ;;  %v3605_v33 = vpack.c.bf16 %v2587_v23, %v2586_v22  ;;  %p3968_p4 = pnand %p3967_p2, %p4138_p3  ;;  %p3973_p6 = scmp.lt.s32.totalorder %s5177_s16, %s3971_s6 }
  0x55   : > { %3468 = vmatpush3.bf16.msra.mxu1 %v3465_v4  ;;  %v504_v26 = vrot.slane %v4345_v24, 1  ;;  %v4355_v28 = vld [vmem:[%s4206_s29 + $0x20] sm:$0xff]  ;;  %v505_v29 = vrot.slane %v4348_v25, 1  ;;  %v509_v30 = vrot.slane %v4352_v27, 1  ;;  %v2541_v35 = vld [vmem:[%s5238_s1 + $0xd8] sm:$0xff]  ;;  %v2543_v43 = vld [vmem:[%s5238_s1 + $0xe8] sm:$0xff] }
  0x56   : > { %3596 = vmatpush3.bf16.msra.mxu0 %v3593_v8  ;;  %3470 = vmatprep.subr.bf16.mxu1 %v3469_v12  ;;  %v510_v31 = vrot.slane %v4355_v28, 1  ;;  %v2588_v38 = vld [vmem:[%s5238_s1 + $0x250] sm:$0xff]  ;;  %v2589_v39 = vld [vmem:[%s5238_s1 + $0x258] sm:$0xff]  ;;  %v3481_v40 = vpack.c.bf16 %v2541_v35, %v2540_v34  ;;  %v2542_v42 = vld [vmem:[%s5238_s1 + $0xe0] sm:$0xff]  ;;  %p3969_p5 = pneg %p3968_p4 }
  0x57   : > { %3598 = vmatprep.subr.bf16.mxu0 %v3597_v13  ;;  %v506_v36 = vsel %vm503_vm0, %v504_v26, %v505_v29  ;;  %v3609_v41 = vpack.c.bf16 %v2589_v39, %v2588_v38  ;;  %v2590_v44 = vld [vmem:[%s5238_s1 + $0x260] sm:$0xff]  ;;  %v2591_v45 = vld [vmem:[%s5238_s1 + $0x268] sm:$0xff]  ;;  %v3485_v46 = vpack.c.bf16 %v2543_v43, %v2542_v42  ;;  %v2544_v48 = vld [vmem:[%s5238_s1 + $0xf0] sm:$0xff]  ;;  %v868_v43 = vrot.slane %v4345_v24, 2 }
  0x58   : > { %v4372_v37 = vsel %vm503_vm0, %v509_v30, %v510_v31  ;;  %2989 = vmatprep.mubr.f32.mxu1 %v506_v36  ;;  %v3613_v47 = vpack.c.bf16 %v2591_v45, %v2590_v44  ;;  %v2545_v49 = vld [vmem:[%s5238_s1 + $0xf8] sm:$0xff]  ;;  %v2592_v50 = vld [vmem:[%s5238_s1 + $0x270] sm:$0xff]  ;;  %v463_v55 = vld [vmem:[%s5238_s1] sm:$0xff] }
  0x59   : > { %3472 = vmatpush3.bf16.msra.mxu1 %v3469_v12  ;;  %3213 = vmatprep.mubr.f32.mxu0 %v4372_v37  ;;  %v2593_v51 = vld [vmem:[%s5238_s1 + $0x278] sm:$0xff]  ;;  %v3489_v52 = vpack.c.bf16 %v2545_v49, %v2544_v48  ;;  %v4406_v53 = vld [vmem:[%s4206_s29 + $0x10] sm:$0x3]  ;;  %v464_v56 = vld [vmem:[%s5238_s1 + $0x8] sm:$0xff]  ;;  %v869_v48 = vrot.slane %v4348_v25, 2 }
  0x5a   : > { %3600 = vmatpush3.bf16.msra.mxu0 %v3597_v13  ;;  %3474 = vmatprep.subr.bf16.mxu1 %v3473_v18  ;;  %v3617_v54 = vpack.c.bf16 %v2593_v51, %v2592_v50  ;;  %v4415_v57 = vld [vmem:[%s4206_s29 + $0x28] sm:$0x3]  ;;  %v2594_v58 = vld [vmem:[%s5238_s1 + $0x280] sm:$0xff]  ;;  %v507_v60 = vrot.slane %v4406_v53, 1  ;;  %v4428_v62 = vld [vmem:[%s4206_s29 + $0x38] sm:$0xff]  ;;  %v3493_v63 = vpack.c.bf16 %v464_v56, %v463_v55 }
  0x5b   : > { %3602 = vmatprep.subr.bf16.mxu0 %v3601_v21  ;;  %v2595_v59 = vld [vmem:[%s5238_s1 + $0x288] sm:$0xff]  ;;  %v4425_v61 = vld [vmem:[%s4206_s29 + $0x30] sm:$0xff]  ;;  %v512_v0 = vrot.slane %v4415_v57, 1  ;;  %v4432_v2 = vld [vmem:[%s4206_s29 + $0x40] sm:$0x3]  ;;  %v515_v4 = vrot.slane %v4428_v62, 1 }
  0x5c   : > { %v3621_v1 = vpack.c.bf16 %v2595_v59, %v2594_v58  ;;  %v514_v3 = vrot.slane %v4425_v61, 1  ;;  %v465_v5 = vld [vmem:[%s5238_s1 + $0x10] sm:$0xff]  ;;  %v466_v6 = vld [vmem:[%s5238_s1 + $0x18] sm:$0xff]  ;;  %v508_v8 = vsel %vm503_vm0, %v505_v29, %v507_v60  ;;  %v517_v13 = vrot.slane %v4432_v2, 1  ;;  %v467_v15 = vld [vmem:[%s5238_s1 + $0x20] sm:$0xff] }
  0x5d   : > { %3476 = vmatpush3.bf16.msra.mxu1 %v3473_v18  ;;  %v2596_v7 = vld [vmem:[%s5238_s1 + $0x290] sm:$0xff]  ;;  %v2597_v9 = vld [vmem:[%s5238_s1 + $0x298] sm:$0xff]  ;;  %v513_v12 = vsel %vm503_vm0, %v510_v31, %v512_v0  ;;  %v3497_v14 = vpack.c.bf16 %v466_v6, %v465_v5  ;;  %v2598_v26 = vld [vmem:[%s5238_s1 + $0x2a0] sm:$0xff]  ;;  %v4548_v59 = vsel %vm867_vm1, %v868_v43, %v869_v48 }
  0x5e   : > { %3604 = vmatpush3.bf16.msra.mxu0 %v3601_v21  ;;  %3478 = vmatprep.subr.bf16.mxu1 %v3477_v32  ;;  %v4452_v10 = vld [vmem:[%s4206_s29 + $0x48] sm:$0xff]  ;;  %v4455_v11 = vld [vmem:[%s4206_s29 + $0x50] sm:$0xff]  ;;  %v4465_v16 = vld [vmem:[%s4206_s29 + $0x58] sm:$0x3]  ;;  %v4468_v17 = vsel %vm503_vm0, %v514_v3, %v515_v4  ;;  %v3625_v18 = vpack.c.bf16 %v2597_v9, %v2596_v7  ;;  %v4489_v30 = vsel %vm503_vm0, %v515_v4, %v517_v13 }
  0x5f   : > { %3606 = vmatprep.subr.bf16.mxu0 %v3605_v33  ;;  %v519_v19 = vrot.slane %v4452_v10, 1  ;;  %v520_v20 = vrot.slane %v4455_v11, 1  ;;  %v468_v21 = vld [vmem:[%s5238_s1 + $0x28] sm:$0xff]  ;;  %v4476_v22 = vld [vmem:[%s4206_s29 + $0x60] sm:$0xff]  ;;  %v522_v31 = vrot.slane %v4465_v16, 1  ;;  %v2601_v42 = vld [vmem:[%s5238_s1 + $0x2b8] sm:$0xff] }
  0x60   : > { %v4479_v23 = vld [vmem:[%s4206_s29 + $0x68] sm:$0xff]  ;;  %v469_v35 = vld [vmem:[%s5238_s1 + $0x30] sm:$0xff]  ;;  %v4517_v44 = vld [vmem:[%s4206_s29 + $0x78] sm:$0xff] }
  0x61   : > { %3480 = vmatpush3.bf16.msra.mxu1 %v3477_v32  ;;  %v2599_v29 = vld [vmem:[%s5238_s1 + $0x2a8] sm:$0xff]  ;;  %v3501_v32 = vpack.c.bf16 %v468_v21, %v467_v15  ;;  %v525_v34 = vrot.slane %v4479_v23, 1  ;;  %v4499_v36 = vld [vmem:[%s4206_s29 + $0x70] sm:$0x3]  ;;  %v4503_v38 = vsel %vm503_vm0, %v519_v19, %v520_v20  ;;  %v4520_v45 = vld [vmem:[%s4206_s29 + $0x80] sm:$0xff] }
  0x62   : > { %3608 = vmatpush3.bf16.msra.mxu0 %v3605_v33  ;;  %3482 = vmatprep.subr.bf16.mxu1 %v3481_v40  ;;  %v524_v33 = vrot.slane %v4476_v22, 1  ;;  %v3629_v39 = vpack.c.bf16 %v2599_v29, %v2598_v26  ;;  %v471_v55 = vld [vmem:[%s5238_s1 + $0x40] sm:$0xff]  ;;  %v472_v56 = vld [vmem:[%s5238_s1 + $0x48] sm:$0xff]  ;;  %v473_v13 = vld [vmem:[%s5238_s1 + $0x50] sm:$0xff] }
  0x63   : > { %3610 = vmatprep.subr.bf16.mxu0 %v3609_v41  ;;  %v2602_v58 = vld [vmem:[%s5238_s1 + $0x2c0] sm:$0xff]  ;;  %v3509_v5 = vpack.c.bf16 %v472_v56, %v471_v55  ;;  %v2604_v15 = vld [vmem:[%s5238_s1 + $0x2d0] sm:$0xff]  ;;  %v4592_v19 = vld [vmem:[%s4206_s29 + $0xa8] sm:$0xff] }
  0x64   : > { %v4530_v49 = vsel %vm503_vm0, %v524_v33, %v525_v34  ;;  %v4558_v0 = vld [vmem:[%s4206_s29 + $0x90] sm:$0xff]  ;;  %v4570_v6 = vld [vmem:[%s4206_s29 + $0xa0] sm:$0x3]  ;;  %v4629_v43 = vld [vmem:[%s4206_s29 + $0xc8] sm:$0xff] }
  0x65   : > { %3484 = vmatpush3.bf16.msra.mxu1 %v3481_v40  ;;  %v470_v40 = vld [vmem:[%s5238_s1 + $0x38] sm:$0xff]  ;;  %v534_v9 = vrot.slane %v4558_v0, 1  ;;  %v537_v26 = vrot.slane %v4570_v6, 1  ;;  %v1284_v56 = vrot.slane %v4629_v43, 1 }
  0x66   : > { %3612 = vmatpush3.bf16.msra.mxu0 %v3609_v41  ;;  %3486 = vmatprep.subr.bf16.mxu1 %v3485_v46  ;;  %v2600_v41 = vld [vmem:[%s5238_s1 + $0x2b0] sm:$0xff]  ;;  %v3505_v50 = vpack.c.bf16 %v470_v40, %v469_v35  ;;  %v2606_v40 = vld [vmem:[%s5238_s1 + $0x2e0] sm:$0xff] }
  0x67   : > { %3614 = vmatprep.subr.bf16.mxu0 %v3613_v47  ;;  %v3633_v51 = vpack.c.bf16 %v2601_v42, %v2600_v41  ;;  %v2607_v41 = vld [vmem:[%s5238_s1 + $0x2e8] sm:$0xff]  ;;  %v4626_v42 = vld [vmem:[%s4206_s29 + $0xc0] sm:$0xff] }
  0x68   : > { %v1283_v55 = vrot.slane %v4626_v42, 1 }
  0x69   : > { %3488 = vmatpush3.bf16.msra.mxu1 %v3485_v46  ;;  %v4524_v46 = vsel %vm503_vm0, %v520_v20, %v522_v31  ;;  %v4595_v20 = vld [vmem:[%s4206_s29 + $0xb0] sm:$0xff]  ;;  %v4604_v31 = vld [vmem:[%s4206_s29 + $0xb8] sm:$0x3] }
  0x6a   : > { %3616 = vmatpush3.bf16.msra.mxu0 %v3613_v47  ;;  %3490 = vmatprep.subr.bf16.mxu1 %v3489_v52  ;;  %v527_v47 = vrot.slane %v4499_v36, 1  ;;  %v540_v35 = vrot.slane %v4595_v20, 1 }
  0x6b   : > { %3618 = vmatprep.subr.bf16.mxu0 %v3617_v54 }
  0x6c   : > { %v4565_v3 = vsel %vm503_vm0, %v525_v34, %v527_v47  ;;  %v539_v34 = vrot.slane %v4592_v19, 1 }
  0x6d   : > { %3492 = vmatpush3.bf16.msra.mxu1 %v3489_v52  ;;  %v4533_v52 = vld [vmem:[%s4206_s29 + $0x88] sm:$0x3] }
  0x6e   : > { %3620 = vmatpush3.bf16.msra.mxu0 %v3617_v54  ;;  %3494 = vmatprep.subr.bf16.mxu1 %v3493_v63  ;;  %v530_v54 = vrot.slane %v4520_v45, 1  ;;  %v532_v4 = vrot.slane %v4533_v52, 1 }
  0x6f   : > { %3622 = vmatprep.subr.bf16.mxu0 %v3621_v1 }
  0x70   : > { %2990 = vmatmul.mubr.f32.vlgmr.msra.gmra.mrb[0].mxu1 %v508_v8  ;;  %v4599_v21 = vsel %vm503_vm0, %v530_v54, %v532_v4  ;;  %v2608_v4 = vld [vmem:[%s5238_s1 + $0x2f0] sm:$0xff] }
  0x71   : > { %3214 = vmatmul.mubr.f32.vlgmr.msra.gmra.mrb[0].mxu0 %v513_v12  ;;  %3496 = vmatpush3.bf16.msra.mxu1 %v3493_v63  ;;  %v2603_v63 = vld [vmem:[%s5238_s1 + $0x2c8] sm:$0xff] }
  0x72   : > { %3624 = vmatpush3.bf16.msra.mxu0 %v3621_v1  ;;  %2992 = vmatprep.mubr.f32.mxu1 %v4372_v37  ;;  %v871_v37 = vrot.slane %v4406_v53, 2  ;;  %v529_v53 = vrot.slane %v4517_v44, 1  ;;  %v4561_v1 = vld [vmem:[%s4206_s29 + $0x98] sm:$0xff]  ;;  %v3637_v8 = vpack.c.bf16 %v2603_v63, %v2602_v58  ;;  %v477_v58 = vld [vmem:[%s5238_s1 + $0x70] sm:$0xff] }
  0x73   : > { %3216 = vmatprep.mubr.f32.mxu0 %v4468_v17  ;;  %3498 = vmatprep.subr.bf16.mxu1 %v3497_v14  ;;  %v478_v63 = vld [vmem:[%s5238_s1 + $0x78] sm:$0xff] }
  0x74   : > { %2993 = vmatmul.mubr.f32.gmra.mrb[2].mxu1 %v513_v12  ;;  %3626 = vmatprep.subr.bf16.mxu0 %v3625_v18  ;;  %v4551_v60 = vsel %vm867_vm1, %v869_v48, %v871_v37  ;;  %v4574_v7 = vsel %vm503_vm0, %v529_v53, %v530_v54  ;;  %v535_v12 = vrot.slane %v4561_v1, 1  ;;  %v475_v37 = vld [vmem:[%s5238_s1 + $0x60] sm:$0xff]  ;;  %v542_v48 = vrot.slane %v4604_v31, 1 }
  0x75   : > { %3217 = vmatmul.mubr.f32.gmra.mrb[2].mxu0 %v4489_v30  ;;  %3500 = vmatpush3.bf16.msra.mxu1 %v3497_v14  ;;  %v474_v14 = vld [vmem:[%s5238_s1 + $0x58] sm:$0xff]  ;;  %v4642_v53 = vsel %vm503_vm0, %v539_v34, %v540_v35  ;;  %v3645_v54 = vpack.c.bf16 %v2607_v41, %v2606_v40  ;;  %v2611_v34 = vld [vmem:[%s5238_s1 + $0x308] sm:$0xff] }
  0x76   : > { %3628 = vmatpush3.bf16.msra.mxu0 %v3625_v18  ;;  %2995 = vmatprep.mubr.f32.mxu1 %v4468_v17  ;;  %v2605_v18 = vld [vmem:[%s5238_s1 + $0x2d8] sm:$0xff]  ;;  %v3513_v29 = vpack.c.bf16 %v474_v14, %v473_v13  ;;  %v4633_v47 = vsel %vm503_vm0, %v535_v12, %v537_v26  ;;  %v4667_v13 = vsel %vm503_vm0, %v1283_v55, %v1284_v56  ;;  %v2546_v26 = vld [vmem:[%s5238_s1 + $0x100] sm:$0xff]  ;;  %v2612_v55 = vld [vmem:[%s5238_s1 + $0x310] sm:$0xff] }
  0x77   : > { %3219 = vmatprep.mubr.f32.mxu0 %v4503_v38  ;;  %3502 = vmatprep.subr.bf16.mxu1 %v3501_v32  ;;  %v3641_v33 = vpack.c.bf16 %v2605_v18, %v2604_v15  ;;  %v873_v15 = vrot.slane %v4352_v27, 2  ;;  %v874_v18 = vrot.slane %v4355_v28, 2 }
  0x78   : > { %2996 = vmatmul.mubr.f32.gmra.mrb[4].mxu1 %v4489_v30  ;;  %3630 = vmatprep.subr.bf16.mxu0 %v3629_v39 }
  0x79   : > { %3220 = vmatmul.mubr.f32.gmra.mrb[4].mxu0 %v4524_v46  ;;  %3504 = vmatpush3.bf16.msra.mxu1 %v3501_v32  ;;  %v4608_v32 = vsel %vm503_vm0, %v534_v9, %v535_v12  ;;  %v3521_v12 = vpack.c.bf16 %v478_v63, %v477_v58  ;;  %v4692_v40 = vsel %vm867_vm1, %v873_v15, %v874_v18  ;;  %v881_v63 = vrot.slane %v4432_v2, 2  ;;  %v2551_v2 = vld [vmem:[%s5238_s1 + $0x128] sm:$0xff] }
  0x7a   : > { %3632 = vmatpush3.bf16.msra.mxu0 %v3629_v39  ;;  %2998 = vmatprep.mubr.f32.mxu1 %v4503_v38  ;;  %v476_v39 = vld [vmem:[%s5238_s1 + $0x68] sm:$0xff] }
  0x7b   : > { %3222 = vmatprep.mubr.f32.mxu0 %v4530_v49  ;;  %3506 = vmatprep.subr.bf16.mxu1 %v3505_v50  ;;  %v2615_v15 = vld [vmem:[%s5238_s1 + $0x328] sm:$0xff] }
  0x7c   : > { %2999 = vmatmul.mubr.f32.gmra.mrb[6].mxu1 %v4524_v46  ;;  %3634 = vmatprep.subr.bf16.mxu0 %v3633_v51 }
  0x7d   : > { %3223 = vmatmul.mubr.f32.gmra.mrb[6].mxu0 %v4565_v3  ;;  %3508 = vmatpush3.bf16.msra.mxu1 %v3505_v50  ;;  %v3517_v50 = vpack.c.bf16 %v476_v39, %v475_v37 }
  0x7e   : > { %3636 = vmatpush3.bf16.msra.mxu0 %v3633_v51  ;;  %3001 = vmatprep.mubr.f32.mxu1 %v4530_v49  ;;  %v4638_v51 = vld [vmem:[%s4206_s29 + $0xd0] sm:$0x3] }
  0x7f   : > { %3225 = vmatprep.mubr.f32.mxu0 %v4574_v7  ;;  %3510 = vmatprep.subr.bf16.mxu1 %v3509_v5  ;;  %v1286_v9 = vrot.slane %v4638_v51, 1 }
  0x80   : > { %3002 = vmatmul.mubr.f32.gmra.mrb[8].mxu1 %v4565_v3  ;;  %3638 = vmatprep.subr.bf16.mxu0 %v3637_v8 }
  0x81   : > { %3226 = vmatmul.mubr.f32.gmra.mrb[8].mxu0 %v4599_v21  ;;  %3512 = vmatpush3.bf16.msra.mxu1 %v3509_v5  ;;  %v2609_v5 = vld [vmem:[%s5238_s1 + $0x2f8] sm:$0xff]  ;;  %v4687_v37 = vsel %vm503_vm0, %v1284_v56, %v1286_v9 }
  0x82   : > { %3640 = vmatpush3.bf16.msra.mxu0 %v3637_v8  ;;  %3004 = vmatprep.mubr.f32.mxu1 %v4574_v7  ;;  %v4661_v8 = vsel %vm503_vm0, %v540_v35, %v542_v48  ;;  %v3649_v14 = vpack.c.bf16 %v2609_v5, %v2608_v4  ;;  %v876_v35 = vrot.slane %v4415_v57, 2  ;;  %v878_v48 = vrot.slane %v4425_v61, 2  ;;  %v2613_v56 = vld [vmem:[%s5238_s1 + $0x318] sm:$0xff] }
  0x83   : > { %3228 = vmatprep.mubr.f32.mxu0 %v4608_v32  ;;  %3514 = vmatprep.subr.bf16.mxu1 %v3513_v29  ;;  %v879_v57 = vrot.slane %v4428_v62, 2  ;;  %v3657_v9 = vpack.c.bf16 %v2613_v56, %v2612_v55 }
  0x84   : > { %3005 = vmatmul.mubr.f32.gmra.mrb[10].mxu1 %v4599_v21  ;;  %3642 = vmatprep.subr.bf16.mxu0 %v3641_v33  ;;  %v4711_v58 = vsel %vm867_vm1, %v874_v18, %v876_v35  ;;  %v888_v35 = vrot.slane %v4476_v22, 2 }
  0x85   : > { %3229 = vmatmul.mubr.f32.gmra.mrb[10].mxu0 %v4633_v47  ;;  %3516 = vmatpush3.bf16.msra.mxu1 %v3513_v29  ;;  %v2547_v29 = vld [vmem:[%s5238_s1 + $0x108] sm:$0xff]  ;;  %v4717_v5 = vsel %vm867_vm1, %v878_v48, %v879_v57  ;;  %v4736_v18 = vsel %vm867_vm1, %v879_v57, %v881_v63  ;;  %v2616_v48 = vld [vmem:[%s5238_s1 + $0x330] sm:$0xff]  ;;  %v2617_v57 = vld [vmem:[%s5238_s1 + $0x338] sm:$0xff] }
  0x86   : > { %3644 = vmatpush3.bf16.msra.mxu0 %v3641_v33  ;;  %3007 = vmatprep.mubr.f32.mxu1 %v4608_v32  ;;  %v2610_v33 = vld [vmem:[%s5238_s1 + $0x300] sm:$0xff]  ;;  %v3525_v39 = vpack.c.bf16 %v2547_v29, %v2546_v26  ;;  %v886_v26 = vrot.slane %v4465_v16, 2  ;;  %v2553_v16 = vld [vmem:[%s5238_s1 + $0x138] sm:$0xff]  ;;  %v3665_v63 = vpack.c.bf16 %v2617_v57, %v2616_v48  ;;  %v901_v57 = vrot.slane %v4570_v6, 2  ;;  %v2559_v6 = vld [vmem:[%s5238_s1 + $0x168] sm:$0xff] }
  0x87   : > { %3231 = vmatprep.mubr.f32.mxu0 %v4642_v53  ;;  %3518 = vmatprep.subr.bf16.mxu1 %v3517_v50  ;;  %v3653_v41 = vpack.c.bf16 %v2611_v34, %v2610_v33 }
  0x88   : > { %3008 = vmatmul.mubr.f32.gmra.mrb[12].mxu1 %v4633_v47  ;;  %3646 = vmatprep.subr.bf16.mxu0 %v3645_v54 }
  0x89   : > { %3232 = vmatmul.mubr.f32.gmra.mrb[12].mxu0 %v4661_v8  ;;  %3520 = vmatpush3.bf16.msra.mxu1 %v3517_v50  ;;  %v2548_v50 = vld [vmem:[%s5238_s1 + $0x110] sm:$0xff] }
  0x8a   : > { %3648 = vmatpush3.bf16.msra.mxu0 %v3645_v54  ;;  %3010 = vmatprep.mubr.f32.mxu1 %v4642_v53  ;;  %v2549_v54 = vld [vmem:[%s5238_s1 + $0x118] sm:$0xff] }
  0x8b   : > { %3234 = vmatprep.mubr.f32.mxu0 %v4667_v13  ;;  %3522 = vmatprep.subr.bf16.mxu1 %v3521_v12  ;;  %v3529_v4 = vpack.c.bf16 %v2549_v54, %v2548_v50  ;;  %v891_v54 = vrot.slane %v4499_v36, 2  ;;  %v2555_v36 = vld [vmem:[%s5238_s1 + $0x148] sm:$0xff] }
  0x8c   : > { %3011 = vmatmul.mubr.f32.gmra.mrb[14].mxu1 %v4661_v8  ;;  %3650 = vmatprep.subr.bf16.mxu0 %v3649_v14 }
  0x8d   : > { %3235 = vmatmul.mubr.f32.gmra.mrb[14].mxu0 %v4687_v37  ;;  %3524 = vmatpush3.bf16.msra.mxu1 %v3521_v12  ;;  %v883_v12 = vrot.slane %v4452_v10, 2 }
  0x8e   : > { %3652 = vmatpush3.bf16.msra.mxu0 %v3649_v14  ;;  %3045 = vmatprep.mubr.f32.mxu1 %v4345_v24  ;;  %v884_v24 = vrot.slane %v4455_v11, 2  ;;  %v2550_v14 = vld [vmem:[%s5238_s1 + $0x120] sm:$0xff] }
  0x8f   : > { %3269 = vmatprep.mubr.f32.mxu0 %v4692_v40  ;;  %3526 = vmatprep.subr.bf16.mxu1 %v3525_v39  ;;  %v3533_v29 = vpack.c.bf16 %v2551_v2, %v2550_v14  ;;  %v2619_v14 = vld [vmem:[%s5238_s1 + $0x348] sm:$0xff] }
  0x90   : > { %3046 = vmatmul.mubr.f32.vlgmr.msra.gmra.mrb[0].mxu1 %v4348_v25  ;;  %3654 = vmatprep.subr.bf16.mxu0 %v3653_v41  ;;  %v2614_v25 = vld [vmem:[%s5238_s1 + $0x320] sm:$0xff]  ;;  %v4742_v33 = vsel %vm867_vm1, %v883_v12, %v884_v24  ;;  %v4761_v50 = vsel %vm867_vm1, %v884_v24, %v886_v26 }
  0x91   : > { %3270 = vmatmul.mubr.f32.vlgmr.msra.gmra.mrb[0].mxu0 %v4711_v58  ;;  %3528 = vmatpush3.bf16.msra.mxu1 %v3525_v39  ;;  %v3661_v34 = vpack.c.bf16 %v2615_v15, %v2614_v25  ;;  %v889_v39 = vrot.slane %v4479_v23, 2  ;;  %v2554_v12 = vld [vmem:[%s5238_s1 + $0x140] sm:$0xff]  ;;  %v896_v25 = vrot.slane %v4533_v52, 2  ;;  %v2557_v52 = vld [vmem:[%s5238_s1 + $0x158] sm:$0xff] }
  0x92   : > { %3656 = vmatpush3.bf16.msra.mxu0 %v3653_v41  ;;  %3048 = vmatprep.mubr.f32.mxu1 %v4352_v27  ;;  %v2552_v41 = vld [vmem:[%s5238_s1 + $0x130] sm:$0xff]  ;;  %v2618_v24 = vld [vmem:[%s5238_s1 + $0x340] sm:$0xff]  ;;  %v3541_v15 = vpack.c.bf16 %v2555_v36, %v2554_v12  ;;  %v904_v12 = vrot.slane %v4595_v20, 2 }
  0x93   : > { %3272 = vmatprep.mubr.f32.mxu0 %v4717_v5  ;;  %3530 = vmatprep.subr.bf16.mxu1 %v3529_v4  ;;  %v3537_v55 = vpack.c.bf16 %v2553_v16, %v2552_v41  ;;  %v4767_v56 = vsel %vm867_vm1, %v888_v35, %v889_v39  ;;  %v4786_v2 = vsel %vm867_vm1, %v889_v39, %v891_v54  ;;  %v899_v35 = vrot.slane %v4561_v1, 2  ;;  %v2556_v39 = vld [vmem:[%s5238_s1 + $0x150] sm:$0xff]  ;;  %v2621_v16 = vld [vmem:[%s5238_s1 + $0x358] sm:$0xff]  ;;  %v2622_v36 = vld [vmem:[%s5238_s1 + $0x360] sm:$0xff] }
  0x94   : > { %3049 = vmatmul.mubr.f32.gmra.mrb[2].mxu1 %v4355_v28  ;;  %3658 = vmatprep.subr.bf16.mxu0 %v3657_v9  ;;  %v2620_v41 = vld [vmem:[%s5238_s1 + $0x350] sm:$0xff]  ;;  %v3545_v54 = vpack.c.bf16 %v2557_v52, %v2556_v39  ;;  %v1469_v52 = vrot.slane %v4629_v43, 2 }
  0x95   : > { %3273 = vmatmul.mubr.f32.gmra.mrb[2].mxu0 %v4736_v18  ;;  %3532 = vmatpush3.bf16.msra.mxu1 %v3529_v4  ;;  %v893_v4 = vrot.slane %v4517_v44, 2 }
  0x96   : > { %3660 = vmatpush3.bf16.msra.mxu0 %v3657_v9  ;;  %3051 = vmatprep.mubr.f32.mxu1 %v4425_v61  ;;  %v894_v9 = vrot.slane %v4520_v45, 2 }
  0x97   : > { %3275 = vmatprep.mubr.f32.mxu0 %v4742_v33  ;;  %3534 = vmatprep.subr.bf16.mxu1 %v3533_v29 }
  0x98   : > { %3052 = vmatmul.mubr.f32.gmra.mrb[4].mxu1 %v4428_v62  ;;  %3662 = vmatprep.subr.bf16.mxu0 %v3661_v34  ;;  %v4792_v26 = vsel %vm867_vm1, %v893_v4, %v894_v9  ;;  %v4811_v48 = vsel %vm867_vm1, %v894_v9, %v896_v25  ;;  %v3673_v4 = vpack.c.bf16 %v2621_v16, %v2620_v41  ;;  %v2558_v9 = vld [vmem:[%s5238_s1 + $0x160] sm:$0xff]  ;;  %v906_v25 = vrot.slane %v4604_v31, 2  ;;  %v2561_v31 = vld [vmem:[%s5238_s1 + $0x178] sm:$0xff]  ;;  %v2624_v41 = vld [vmem:[%s5238_s1 + $0x370] sm:$0xff] }
  0x99   : > { %3276 = vmatmul.mubr.f32.gmra.mrb[4].mxu0 %v4761_v50  ;;  %3536 = vmatpush3.bf16.msra.mxu1 %v3533_v29  ;;  %v3669_v29 = vpack.c.bf16 %v2619_v14, %v2618_v24  ;;  %v2623_v24 = vld [vmem:[%s5238_s1 + $0x368] sm:$0xff]  ;;  %v4836_v14 = vsel %vm867_vm1, %v899_v35, %v901_v57  ;;  %v2625_v16 = vld [vmem:[%s5238_s1 + $0x378] sm:$0xff] }
  0x9a   : > { %3664 = vmatpush3.bf16.msra.mxu0 %v3661_v34  ;;  %3054 = vmatprep.mubr.f32.mxu1 %v4452_v10  ;;  %v898_v34 = vrot.slane %v4558_v0, 2  ;;  %v3677_v39 = vpack.c.bf16 %v2623_v24, %v2622_v36  ;;  %v4861_v57 = vsel %vm867_vm1, %v904_v12, %v906_v25  ;;  %v2627_v36 = vld [vmem:[%s5238_s1 + $0x388] sm:$0xff] }
  0x9b   : > { %3278 = vmatprep.mubr.f32.mxu0 %v4767_v56  ;;  %3538 = vmatprep.subr.bf16.mxu1 %v3537_v55 }
  0x9c   : > { %3055 = vmatmul.mubr.f32.gmra.mrb[6].mxu1 %v4455_v11  ;;  %3666 = vmatprep.subr.bf16.mxu0 %v3665_v63 }
  0x9d   : > { %3279 = vmatmul.mubr.f32.gmra.mrb[6].mxu0 %v4786_v2  ;;  %3540 = vmatpush3.bf16.msra.mxu1 %v3537_v55  ;;  %v4817_v55 = vsel %vm867_vm1, %v898_v34, %v899_v35  ;;  %v2560_v35 = vld [vmem:[%s5238_s1 + $0x170] sm:$0xff] }
  0x9e   : > { %3668 = vmatpush3.bf16.msra.mxu0 %v3665_v63  ;;  %3057 = vmatprep.mubr.f32.mxu1 %v4476_v22  ;;  %v903_v63 = vrot.slane %v4592_v19, 2 }
  0x9f   : > { %3281 = vmatprep.mubr.f32.mxu0 %v4792_v26  ;;  %3542 = vmatprep.subr.bf16.mxu1 %v3541_v15 }
  0xa0   : > { %3058 = vmatmul.mubr.f32.gmra.mrb[8].mxu1 %v4479_v23  ;;  %3670 = vmatprep.subr.bf16.mxu0 %v3669_v29  ;;  %v4842_v34 = vsel %vm867_vm1, %v903_v63, %v904_v12  ;;  %v1471_v63 = vrot.slane %v4638_v51, 2  ;;  %v2563_v12 = vld [vmem:[%s5238_s1 + $0x188] sm:$0xff]  ;;  %v2626_v51 = vld [vmem:[%s5238_s1 + $0x380] sm:$0xff] }
  0xa1   : > { %3282 = vmatmul.mubr.f32.gmra.mrb[8].mxu0 %v4811_v48  ;;  %3544 = vmatpush3.bf16.msra.mxu1 %v3541_v15  ;;  %v3549_v15 = vpack.c.bf16 %v2559_v6, %v2558_v9  ;;  %v3681_v6 = vpack.c.bf16 %v2625_v16, %v2624_v41  ;;  %v2566_v16 = vld [vmem:[%s5238_s1 + $0x1a0] sm:$0xff] }
  0xa2   : > { %3672 = vmatpush3.bf16.msra.mxu0 %v3669_v29  ;;  %3060 = vmatprep.mubr.f32.mxu1 %v4517_v44  ;;  %v1468_v29 = vrot.slane %v4626_v42, 2  ;;  %v4884_v24 = vsel %vm867_vm1, %v1469_v52, %v1471_v63  ;;  %v2567_v63 = vld [vmem:[%s5238_s1 + $0x1a8] sm:$0xff] }
  0xa3   : > { %3284 = vmatprep.mubr.f32.mxu0 %v4817_v55  ;;  %3546 = vmatprep.subr.bf16.mxu1 %v3545_v54 }
  0xa4   : > { %3061 = vmatmul.mubr.f32.gmra.mrb[10].mxu1 %v4520_v45  ;;  %3674 = vmatprep.subr.bf16.mxu0 %v3673_v4  ;;  %v4867_v9 = vsel %vm867_vm1, %v1468_v29, %v1469_v52  ;;  %v2564_v29 = vld [vmem:[%s5238_s1 + $0x190] sm:$0xff] }
  0xa5   : > { %3285 = vmatmul.mubr.f32.gmra.mrb[10].mxu0 %v4836_v14  ;;  %3548 = vmatpush3.bf16.msra.mxu1 %v3545_v54  ;;  %v3553_v54 = vpack.c.bf16 %v2561_v31, %v2560_v35  ;;  %v2628_v52 = vld [vmem:[%s5238_s1 + $0x390] sm:$0xff]  ;;  %v2629_v35 = vld [vmem:[%s5238_s1 + $0x398] sm:$0xff] }
  0xa6   : > { %3676 = vmatpush3.bf16.msra.mxu0 %v3673_v4  ;;  %3063 = vmatprep.mubr.f32.mxu1 %v4558_v0  ;;  %v2562_v4 = vld [vmem:[%s5238_s1 + $0x180] sm:$0xff]  ;;  %v3689_v41 = vpack.c.bf16 %v2629_v35, %v2628_v52 }
  0xa7   : > { %3287 = vmatprep.mubr.f32.mxu0 %v4842_v34  ;;  %3550 = vmatprep.subr.bf16.mxu1 %v3549_v15  ;;  %v3557_v25 = vpack.c.bf16 %v2563_v12, %v2562_v4  ;;  %v2568_v4 = vld [vmem:[%s5238_s1 + $0x1b0] sm:$0xff]  ;;  %v2569_v12 = vld [vmem:[%s5238_s1 + $0x1b8] sm:$0xff] }
  0xa8   : > { %3064 = vmatmul.mubr.f32.gmra.mrb[12].mxu1 %v4561_v1  ;;  %3678 = vmatprep.subr.bf16.mxu0 %v3677_v39 }
  0xa9   : > { %3288 = vmatmul.mubr.f32.gmra.mrb[12].mxu0 %v4861_v57  ;;  %3552 = vmatpush3.bf16.msra.mxu1 %v3549_v15  ;;  %v3685_v15 = vpack.c.bf16 %v2627_v36, %v2626_v51  ;;  %v3569_v51 = vpack.c.bf16 %v2569_v12, %v2568_v4  ;;  %v2638_v4 = vld [vmem:[%s5238_s1 + $0x3e0] sm:$0xff]  ;;  %v2639_v12 = vld [vmem:[%s5238_s1 + $0x3e8] sm:$0xff] }
  0xaa   : > { %3680 = vmatpush3.bf16.msra.mxu0 %v3677_v39  ;;  %3066 = vmatprep.mubr.f32.mxu1 %v4592_v19  ;;  %v2565_v39 = vld [vmem:[%s5238_s1 + $0x198] sm:$0xff] }
  0xab   : > { %3290 = vmatprep.mubr.f32.mxu0 %v4867_v9  ;;  %3554 = vmatprep.subr.bf16.mxu1 %v3553_v54  ;;  %v3561_v31 = vpack.c.bf16 %v2565_v39, %v2564_v29  ;;  %v2634_v29 = vld [vmem:[%s5238_s1 + $0x3c0] sm:$0xff]  ;;  %v2635_v39 = vld [vmem:[%s5238_s1 + $0x3c8] sm:$0xff] }
  0xac   : > { %3067 = vmatmul.mubr.f32.gmra.mrb[14].mxu1 %v4595_v20  ;;  %3682 = vmatprep.subr.bf16.mxu0 %v3681_v6  ;;  %v3701_v35 = vpack.c.bf16 %v2635_v39, %v2634_v29  ;;  %v5001_v39 = vld [vmem:[%s4206_s29 + $0xd8] sm:$0xff] }
  0xad   : > { %3291 = vmatmul.mubr.f32.gmra.mrb[14].mxu0 %v4884_v24  ;;  %3556 = vmatpush3.bf16.msra.mxu1 %v3553_v54  ;;  %v3565_v54 = vpack.c.bf16 %v2567_v63, %v2566_v16  ;;  %v2636_v16 = vld [vmem:[%s5238_s1 + $0x3d0] sm:$0xff]  ;;  %v2637_v63 = vld [vmem:[%s5238_s1 + $0x3d8] sm:$0xff] }
  0xae   : > { %3684 = vmatpush3.bf16.msra.mxu0 %v3681_v6  ;;  %3101 = vmatprep.mubr.f32.mxu1 %v4548_v59  ;;  %v2630_v59 = vld [vmem:[%s5238_s1 + $0x3a0] sm:$0xff] }
  0xaf   : > { %3325 = vmatprep.mubr.f32.mxu0 %v4425_v61  ;;  %3558 = vmatprep.subr.bf16.mxu1 %v3557_v25 }
  0xb0   : > { %3102 = vmatmul.mubr.f32.vlgmr.msra.gmra.mrb[0].mxu1 %v4551_v60  ;;  %3686 = vmatprep.subr.bf16.mxu0 %v3685_v15  ;;  %v2631_v60 = vld [vmem:[%s5238_s1 + $0x3a8] sm:$0xff] }
  0xb1   : > { %3326 = vmatmul.mubr.f32.vlgmr.msra.gmra.mrb[0].mxu0 %v4428_v62  ;;  %3560 = vmatpush3.bf16.msra.mxu1 %v3557_v25  ;;  %v3693_v6 = vpack.c.bf16 %v2631_v60, %v2630_v59  ;;  %v2570_v25 = vld [vmem:[%s5238_s1 + $0x1c0] sm:$0xff]  ;;  %v3705_v60 = vpack.c.bf16 %v2637_v63, %v2636_v16  ;;  %v2644_v63 = vld [vmem:[%s5238_s1 + $0x410] sm:$0xff] }
  0xb2   : > { %3688 = vmatpush3.bf16.msra.mxu0 %v3685_v15  ;;  %3104 = vmatprep.mubr.f32.mxu1 %v4692_v40  ;;  %v2632_v40 = vld [vmem:[%s5238_s1 + $0x3b0] sm:$0xff]  ;;  %v2571_v15 = vld [vmem:[%s5238_s1 + $0x1c8] sm:$0xff] }
  0xb3   : > { %3328 = vmatprep.mubr.f32.mxu0 %v4452_v10  ;;  %3562 = vmatprep.subr.bf16.mxu1 %v3561_v31  ;;  %v3573_v52 = vpack.c.bf16 %v2571_v15, %v2570_v25  ;;  %v2640_v25 = vld [vmem:[%s5238_s1 + $0x3f0] sm:$0xff]  ;;  %v2641_v15 = vld [vmem:[%s5238_s1 + $0x3f8] sm:$0xff] }
  0xb4   : > { %3105 = vmatmul.mubr.f32.gmra.mrb[2].mxu1 %v4711_v58  ;;  %3690 = vmatprep.subr.bf16.mxu0 %v3689_v41  ;;  %v2633_v58 = vld [vmem:[%s5238_s1 + $0x3b8] sm:$0xff] }
  0xb5   : > { %3329 = vmatmul.mubr.f32.gmra.mrb[2].mxu0 %v4455_v11  ;;  %3564 = vmatpush3.bf16.msra.mxu1 %v3561_v31  ;;  %v3697_v36 = vpack.c.bf16 %v2633_v58, %v2632_v40  ;;  %v2572_v31 = vld [vmem:[%s5238_s1 + $0x1d0] sm:$0xff]  ;;  %v3709_v58 = vpack.c.bf16 %v2639_v12, %v2638_v4 }
  0xb6   : > { %3692 = vmatpush3.bf16.msra.mxu0 %v3689_v41  ;;  %3107 = vmatprep.mubr.f32.mxu1 %v4717_v5  ;;  %v2573_v41 = vld [vmem:[%s5238_s1 + $0x1d8] sm:$0xff] }
  0xb7   : > { %3331 = vmatprep.mubr.f32.mxu0 %v4476_v22  ;;  %3566 = vmatprep.subr.bf16.mxu1 %v3565_v54  ;;  %v3577_v59 = vpack.c.bf16 %v2573_v41, %v2572_v31  ;;  %v2643_v31 = vld [vmem:[%s5238_s1 + $0x408] sm:$0xff]  ;;  %v5012_v41 = vld [vmem:[%s4206_s29 + $0xe0] sm:$0xff] }
  0xb8   : > { %3108 = vmatmul.mubr.f32.gmra.mrb[4].mxu1 %v4736_v18  ;;  %3694 = vmatprep.subr.bf16.mxu0 %v3693_v6 }
  0xb9   : > { %3332 = vmatmul.mubr.f32.gmra.mrb[4].mxu0 %v4479_v23  ;;  %3568 = vmatpush3.bf16.msra.mxu1 %v3565_v54  ;;  %v2574_v54 = vld [vmem:[%s5238_s1 + $0x1e0] sm:$0xff] }
  0xba   : > { %3696 = vmatpush3.bf16.msra.mxu0 %v3693_v6  ;;  %3110 = vmatprep.mubr.f32.mxu1 %v4742_v33  ;;  %v2575_v6 = vld [vmem:[%s5238_s1 + $0x1e8] sm:$0xff] }
  0xbb   : > { %3334 = vmatprep.mubr.f32.mxu0 %v4517_v44  ;;  %3570 = vmatprep.subr.bf16.mxu1 %v3569_v51  ;;  %v3581_v40 = vpack.c.bf16 %v2575_v6, %v2574_v54  ;;  %v2646_v54 = vld [vmem:[%s5238_s1 + $0x420] sm:$0xff]  ;;  %v2647_v6 = vld [vmem:[%s5238_s1 + $0x428] sm:$0xff] }
  0xbc   : > { %3111 = vmatmul.mubr.f32.gmra.mrb[6].mxu1 %v4761_v50  ;;  %3698 = vmatprep.subr.bf16.mxu0 %v3697_v36 }
  0xbd   : > { %3335 = vmatmul.mubr.f32.gmra.mrb[6].mxu0 %v4520_v45  ;;  %3572 = vmatpush3.bf16.msra.mxu1 %v3569_v51  ;;  %v2576_v51 = vld [vmem:[%s5238_s1 + $0x1f0] sm:$0xff] }
  0xbe   : > { %3700 = vmatpush3.bf16.msra.mxu0 %v3697_v36  ;;  %3113 = vmatprep.mubr.f32.mxu1 %v4767_v56  ;;  %v2577_v36 = vld [vmem:[%s5238_s1 + $0x1f8] sm:$0xff] }
  0xbf   : > { %3337 = vmatprep.mubr.f32.mxu0 %v4558_v0  ;;  %3574 = vmatprep.subr.bf16.mxu1 %v3573_v52  ;;  %v3585_v29 = vpack.c.bf16 %v2577_v36, %v2576_v51 }
  0xc0   : > { %3114 = vmatmul.mubr.f32.gmra.mrb[8].mxu1 %v4786_v2  ;;  %3702 = vmatprep.subr.bf16.mxu0 %v3701_v35 }
  0xc1   : > { %3338 = vmatmul.mubr.f32.gmra.mrb[8].mxu0 %v4561_v1  ;;  %3576 = vmatpush3.bf16.msra.mxu1 %v3573_v52  ;;  %v3713_v52 = vpack.c.bf16 %v2641_v15, %v2640_v25 }
  0xc2   : > { %3704 = vmatpush3.bf16.msra.mxu0 %v3701_v35  ;;  %3116 = vmatprep.mubr.f32.mxu1 %v4792_v26  ;;  %v2642_v35 = vld [vmem:[%s5238_s1 + $0x400] sm:$0xff] }
  0xc3   : > { %3340 = vmatprep.mubr.f32.mxu0 %v4592_v19  ;;  %3578 = vmatprep.subr.bf16.mxu1 %v3577_v59  ;;  %v3717_v16 = vpack.c.bf16 %v2643_v31, %v2642_v35 }
  0xc4   : > { %3117 = vmatmul.mubr.f32.gmra.mrb[10].mxu1 %v4811_v48  ;;  %3706 = vmatprep.subr.bf16.mxu0 %v3705_v60 }
  0xc5   : > { %3341 = vmatmul.mubr.f32.gmra.mrb[10].mxu0 %v4595_v20  ;;  %3580 = vmatpush3.bf16.msra.mxu1 %v3577_v59  ;;  %v2645_v59 = vld [vmem:[%s5238_s1 + $0x418] sm:$0xff] }
  0xc6   : > { %3708 = vmatpush3.bf16.msra.mxu0 %v3705_v60  ;;  %3119 = vmatprep.mubr.f32.mxu1 %v4817_v55  ;;  %v3721_v60 = vpack.c.bf16 %v2645_v59, %v2644_v63  ;;  %v5131_v63 = vld [vmem:[%s5239_s2] ss:$0 sm:$0xff] }
  0xc7   : > { %3343 = vmatprep.mubr.f32.mxu0 %v4626_v42  ;;  %3582 = vmatprep.subr.bf16.mxu1 %v3581_v40 }
  0xc8   : > { %3120 = vmatmul.mubr.f32.gmra.mrb[12].mxu1 %v4836_v14  ;;  %3710 = vmatprep.subr.bf16.mxu0 %v3709_v58 }
  0xc9   : > { %3344 = vmatmul.mubr.f32.gmra.mrb[12].mxu0 %v4629_v43  ;;  %3584 = vmatpush3.bf16.msra.mxu1 %v3581_v40 }
  0xca   : > { %3712 = vmatpush3.bf16.msra.mxu0 %v3709_v58  ;;  %3122 = vmatprep.mubr.f32.mxu1 %v4842_v34 }
  0xcb   : > { %3346 = vmatprep.mubr.f32.mxu0 %v5001_v39  ;;  %3586 = vmatprep.subr.bf16.mxu1 %v3585_v29 }
  0xcc   : > { %3123 = vmatmul.mubr.f32.gmra.mrb[14].mxu1 %v4861_v57  ;;  %3714 = vmatprep.subr.bf16.mxu0 %v3713_v52 }
  0xcd   : > { %3347 = vmatmul.mubr.f32.gmra.mrb[14].mxu0 %v5012_v41  ;;  %3588 = vmatpush3.bf16.msra.mxu1 %v3585_v29 }
  0xce   : > { %3716 = vmatpush3.bf16.msra.mxu0 %v3713_v52  ;;  %3157 = vmatprep.mubr.f32.mxu1 %v4352_v27  ;;  %v3725_v27 = vpack.c.bf16 %v2647_v6, %v2646_v54 }
  0xcf   : > { %3381 = vmatprep.mubr.f32.mxu0 %v4468_v17  ;;  %3718 = vmatprep.subr.bf16.mxu0 %v3717_v16  ;;  %v2649_v17 = vld [vmem:[%s5238_s1 + $0x438] sm:$0xff] }
  0xd0   : > { %3158 = vmatmul.mubr.f32.vlgmr.msra.gmra.mrb[0].mxu1 %v4355_v28  ;;  %3749 = vmatprep.subr.bf16.mxu1 %v3717_v16  ;;  %v2648_v28 = vld [vmem:[%s5238_s1 + $0x430] sm:$0xff] }
  0xd1   : > { %3382 = vmatmul.mubr.f32.vlgmr.msra.gmra.mrb[0].mxu0 %v4489_v30  ;;  %3757 = vmatpush3.bf16.msra.mxu1 %v3717_v16  ;;  %v2651_v30 = vld [vmem:[%s5238_s1 + $0x448] sm:$0xff] }
  0xd2   : > { %3720 = vmatpush3.bf16.msra.mxu0 %v3717_v16  ;;  %3160 = vmatprep.mubr.f32.mxu1 %v4425_v61  ;;  %v3729_v61 = vpack.c.bf16 %v2649_v17, %v2648_v28 }
  0xd3   : > { %3384 = vmatprep.mubr.f32.mxu0 %v4503_v38  ;;  %3722 = vmatprep.subr.bf16.mxu0 %v3721_v60  ;;  %v2653_v38 = vld [vmem:[%s5238_s1 + $0x458] sm:$0xff] }
  0xd4   : > { %3161 = vmatmul.mubr.f32.gmra.mrb[2].mxu1 %v4428_v62  ;;  %3750 = vmatprep.subr.bf16.mxu1 %v3721_v60  ;;  %v2650_v62 = vld [vmem:[%s5238_s1 + $0x440] sm:$0xff] }
  0xd5   : > { %3385 = vmatmul.mubr.f32.gmra.mrb[2].mxu0 %v4524_v46  ;;  %3758 = vmatpush3.bf16.msra.mxu1 %v3721_v60  ;;  %v2655_v46 = vld [vmem:[%s5238_s1 + $0x468] sm:$0xff] }
  0xd6   : > { %3724 = vmatpush3.bf16.msra.mxu0 %v3721_v60  ;;  %3163 = vmatprep.mubr.f32.mxu1 %v4452_v10  ;;  %v3733_v10 = vpack.c.bf16 %v2651_v30, %v2650_v62 }
  0xd7   : > { %3387 = vmatprep.mubr.f32.mxu0 %v4530_v49  ;;  %3726 = vmatprep.subr.bf16.mxu0 %v3725_v27  ;;  %v1834_v49 = vrot.slane %v5001_v39, 1 }
  0xd8   : > { %3164 = vmatmul.mubr.f32.gmra.mrb[4].mxu1 %v4455_v11  ;;  %3751 = vmatprep.subr.bf16.mxu1 %v3725_v27  ;;  %v2652_v11 = vld [vmem:[%s5238_s1 + $0x450] sm:$0xff] }
  0xd9   : > { %3388 = vmatmul.mubr.f32.gmra.mrb[4].mxu0 %v4565_v3  ;;  %3759 = vmatpush3.bf16.msra.mxu1 %v3725_v27  ;;  %v1835_v3 = vrot.slane %v5012_v41, 1 }
  0xda   : > { %3728 = vmatpush3.bf16.msra.mxu0 %v3725_v27  ;;  %3166 = vmatprep.mubr.f32.mxu1 %v4476_v22  ;;  %v3737_v22 = vpack.c.bf16 %v2653_v38, %v2652_v11 }
  0xdb   : > { %3390 = vmatprep.mubr.f32.mxu0 %v4574_v7  ;;  %3730 = vmatprep.subr.bf16.mxu0 %v3729_v61  ;;  %v2656_v7 = vld [vmem:[%s5238_s1 + $0x470] sm:$0xff] }
  0xdc   : > { %3167 = vmatmul.mubr.f32.gmra.mrb[6].mxu1 %v4479_v23  ;;  %3752 = vmatprep.subr.bf16.mxu1 %v3729_v61  ;;  %v2654_v23 = vld [vmem:[%s5238_s1 + $0x460] sm:$0xff] }
  0xdd   : > { %3391 = vmatmul.mubr.f32.gmra.mrb[6].mxu0 %v4599_v21  ;;  %3760 = vmatpush3.bf16.msra.mxu1 %v3729_v61 }
  0xde   : > { %3732 = vmatpush3.bf16.msra.mxu0 %v3729_v61  ;;  %3169 = vmatprep.mubr.f32.mxu1 %v4517_v44  ;;  %v3741_v44 = vpack.c.bf16 %v2655_v46, %v2654_v23 }
  0xdf   : > { %3393 = vmatprep.mubr.f32.mxu0 %v4608_v32  ;;  %3734 = vmatprep.subr.bf16.mxu0 %v3733_v10  ;;  %v1836_v32 = vsel %vm503_vm0, %v1834_v49, %v1835_v3 }
  0xe0   : > { %3170 = vmatmul.mubr.f32.gmra.mrb[8].mxu1 %v4520_v45  ;;  %3753 = vmatprep.subr.bf16.mxu1 %v3733_v10  ;;  %v462_v45 = vld [vmem:[%s4206_s29 + $0xe8] sm:$0x3]  ;;  %s3972_s29 = scalar_lea.vmem %s3971_s6, 4096 }
  0xe1   : > { %3394 = vmatmul.mubr.f32.gmra.mrb[8].mxu0 %v4633_v47  ;;  %3761 = vmatpush3.bf16.msra.mxu1 %v3733_v10  ;;  %v1837_v21 = vrot.slane %v462_v45, 1  ;;  %p3974_p7 = scmp.lt.s32.totalorder %s3972_s29, %s3966_s7 }
  0xe2   : > { %3736 = vmatpush3.bf16.msra.mxu0 %v3733_v10  ;;  %3172 = vmatprep.mubr.f32.mxu1 %v4558_v0  ;;  %v2657_v0 = vld [vmem:[%s5238_s1 + $0x478] sm:$0xff] }
  0xe3   : > { %3396 = vmatprep.mubr.f32.mxu0 %v4642_v53  ;;  %3738 = vmatprep.subr.bf16.mxu0 %v3737_v22  ;;  %v1838_v47 = vsel %vm503_vm0, %v1835_v3, %v1837_v21  ;;  %p3975_p9 = por %p3974_p7, %p3973_p6 }
  0xe4   : > { %3173 = vmatmul.mubr.f32.gmra.mrb[10].mxu1 %v4561_v1  ;;  %3754 = vmatprep.subr.bf16.mxu1 %v3737_v22  ;;  %v3745_v1 = vpack.c.bf16 %v2657_v0, %v2656_v7 }
  0xe5   : > { %3397 = vmatmul.mubr.f32.gmra.mrb[10].mxu0 %v4661_v8  ;;  %3762 = vmatpush3.bf16.msra.mxu1 %v3737_v22  ;;  %p3976_p10 = pnand %p3975_p9, %p3969_p5 }
  0xe6   : > { %3740 = vmatpush3.bf16.msra.mxu0 %v3737_v22  ;;  %3175 = vmatprep.mubr.f32.mxu1 %v4592_v19  ;;  %v2019_v19 = vrot.slane %v5001_v39, 2 }
  0xe7   : > { %3399 = vmatprep.mubr.f32.mxu0 %v4667_v13  ;;  %3742 = vmatprep.subr.bf16.mxu0 %v3741_v44 }
  0xe8   : > { %3176 = vmatmul.mubr.f32.gmra.mrb[12].mxu1 %v4595_v20  ;;  %3755 = vmatprep.subr.bf16.mxu1 %v3741_v44  ;;  %v2020_v20 = vrot.slane %v5012_v41, 2 }
  0xe9   : > { %3400 = vmatmul.mubr.f32.gmra.mrb[12].mxu0 %v4687_v37  ;;  %3763 = vmatpush3.bf16.msra.mxu1 %v3741_v44 }
  0xea   : > { %3744 = vmatpush3.bf16.msra.mxu0 %v3741_v44  ;;  %3178 = vmatprep.mubr.f32.mxu1 %v4626_v42  ;;  %v2022_v42 = vrot.slane %v462_v45, 2 }
  0xeb   : > { %3402 = vmatprep.mubr.f32.mxu0 %v1836_v32  ;;  %3746 = vmatprep.subr.bf16.mxu0 %v3745_v1 }
  0xec   : > { %3179 = vmatmul.mubr.f32.gmra.mrb[14].mxu1 %v4629_v43  ;;  %3756 = vmatprep.subr.bf16.mxu1 %v3745_v1  ;;  %v2021_v43 = vsel %vm867_vm1, %v2019_v19, %v2020_v20  ;;  %v2023_v53 = vsel %vm867_vm1, %v2020_v20, %v2022_v42 }
  0xed   : > { %3403 = vmatmul.mubr.f32.gmra.mrb[14].mxu0 %v1838_v47  ;;  %3764 = vmatpush3.bf16.msra.mxu1 %v3745_v1 }
  0xee   : > { %3748 = vmatpush3.bf16.msra.mxu0 %v3745_v1  ;;  %3437 = vmatprep.mubr.f32.mxu0 %v4717_v5 }
  0xef   : > { %3449 = vmatprep.mubr.f32.mxu1 %v4817_v55 }
  0xf0   : > { %3450 = vmatmul.mubr.f32.vlgmr.msra.gmra.mrb[16].mxu1 %v4836_v14 }
  0xf1   : > { %3438 = vmatmul.mubr.f32.vlgmr.msra.gmra.mrb[0].mxu0 %v4736_v18  ;;  %3452 = vmatprep.mubr.f32.mxu1 %v4842_v34 }
  0xf2   : > { %3440 = vmatprep.mubr.f32.mxu0 %v4742_v33 }
  0xf4   : > { %3453 = vmatmul.mubr.f32.gmra.mrb[18].mxu1 %v4861_v57 }
  0xf5   : > { %3441 = vmatmul.mubr.f32.gmra.mrb[2].mxu0 %v4761_v50  ;;  %3455 = vmatprep.mubr.f32.mxu1 %v4867_v9 }
  0xf6   : > { %3443 = vmatprep.mubr.f32.mxu0 %v4767_v56 }
  0xf8   : > { %3456 = vmatmul.mubr.f32.gmra.mrb[20].mxu1 %v4884_v24 }
  0xf9   : > { %3444 = vmatmul.mubr.f32.gmra.mrb[4].mxu0 %v4786_v2  ;;  %3458 = vmatprep.mubr.f32.mxu1 %v2021_v43 }
  0xfa   : > { %3446 = vmatprep.mubr.f32.mxu0 %v4792_v26 }
  0xfc   : > { %3459 = vmatmul.mubr.f32.gmra.mrb[22].mxu1 %v2023_v53 }
  0xfd   : > { %3447 = vmatmul.mubr.f32.gmra.mrb[6].mxu0 %v4811_v48 }
 0x1a3   : > { %v3159_v8 = vpop.f32.mrb[0].mxu1 }
 0x1a4   : > { %v1185_v13 = vpop.f32.mrb[1].mxu1 }
 0x1a7   : > { %v3162_v37 = vpop.f32.mrb[2].mxu1 }
 0x1a8   : > { %v1195_v5 = vpop.f32.mrb[3].mxu1 }
 0x1ab   : > { %v5112_v18 = vpop.f32.mrb[4].mxu1 }
 0x1ac   : > { %v5114_v33 = vpop.f32.mrb[5].mxu1 }
 0x1af   : > { %v5116_v50 = vpop.f32.mrb[6].mxu1 }
 0x1b0   : > { %v5118_v56 = vpop.f32.mrb[7].mxu1 }
 0x1b3   : > { %v3171_v2 = vpop.f32.mrb[8].mxu1 }
 0x1b4   : > { %v3395_v55 = vpop.f32.mrb[8].mxu0  ;;  %v1225_v14 = vpop.f32.mrb[9].mxu1 }
 0x1b5   : > { %v3773_v34 = vadd.f32 %v3395_v55, %v3171_v2  ;;  %v1964_v26 = vpop.f32.mrb[9].mxu0 }
 0x1b6   : > { %v3775_v57 = vadd.f32 %v1964_v26, %v1225_v14 }
 0x1b7   : > { %v3174_v9 = vpop.f32.mrb[10].mxu1 }
 0x1b8   : > { %v3398_v48 = vpop.f32.mrb[10].mxu0  ;;  %v1235_v24 = vpop.f32.mrb[11].mxu1 }
 0x1b9   : > { %v3777_v4 = vadd.f32 %v3398_v48, %v3174_v9  ;;  %v1974_v12 = vpop.f32.mrb[11].mxu0 }
 0x1ba   : > { %v3779_v40 = vadd.f32 %v1974_v12, %v1235_v24 }
 0x1bb   : > { %v3177_v58 = vpop.f32.mrb[12].mxu1 }
 0x1bc   : > { %v3401_v51 = vpop.f32.mrb[12].mxu0  ;;  %v1245_v36 = vpop.f32.mrb[13].mxu1 }
 0x1bd   : > { %v5120_v25 = vadd.f32 %v3401_v51, %v3177_v58  ;;  %v1984_v15 = vpop.f32.mrb[13].mxu0 }
 0x1be   : > { %v5122_v29 = vadd.f32 %v1984_v15, %v1245_v36 }
 0x1bf   : > { %v3180_v39 = vpop.f32.mrb[14].mxu1 }
 0x1c0   : > { %v3404_v52 = vpop.f32.mrb[14].mxu0  ;;  %v1255_v35 = vpop.f32.mrb[15].mxu1 }
 0x1c1   : > { %v5124_v31 = vadd.f32 %v3404_v52, %v3180_v39  ;;  %v1994_v41 = vpop.f32.mrb[15].mxu0 }
 0x1c2   : > { %v5126_v16 = vadd.f32 %v1994_v41, %v1255_v35 }
 0x1c3   : > { %v3451_v59 = vpop.f32.mrb[16].mxu1 }
 0x1c4   : > { %v3439_v60 = vpop.f32.mrb[0].mxu0  ;;  %v3774_v54 = vadd.f32 %v3773_v34, %v3451_v59  ;;  %v2149_v6 = vpop.f32.mrb[17].mxu1 }
 0x1c5   : > { %v3765_v27 = vadd.f32 %v3439_v60, %v3159_v8  ;;  %v2109_v28 = vpop.f32.mrb[1].mxu0  ;;  %v3776_v17 = vadd.f32 %v3775_v57, %v2149_v6 }
 0x1c6   : > { %v2220_v61 = vadd.f32 %v3774_v54, %v5131_v63  ;;  %v3766_v62 = vadd.f32 %v2109_v28, %v1185_v13 }
 0x1c7   : > { %v2212_v30 = vadd.f32 %v3765_v27, %v5131_v63  ;;  %v2219_v10 = vadd.f32 %v3776_v17, %v5131_v63  ;;  %v3454_v11 = vpop.f32.mrb[18].mxu1 }
 0x1c8   : > { %v2236_v38 = vadd.f32 3.0, %v2220_v61  ;;  %v2211_v22 = vadd.f32 %v3766_v62, %v5131_v63  ;;  %v3442_v23 = vpop.f32.mrb[2].mxu0  ;;  %v3778_v46 = vadd.f32 %v3777_v4, %v3454_v11  ;;  %v2159_v44 = vpop.f32.mrb[19].mxu1 }
 0x1c9   : > { %v2228_v45 = vadd.f32 3.0, %v2212_v30  ;;  %v2235_v49 = vadd.f32 3.0, %v2219_v10  ;;  %v3767_v3 = vadd.f32 %v3442_v23, %v3162_v37  ;;  %v2119_v7 = vpop.f32.mrb[3].mxu0  ;;  %v3780_v0 = vadd.f32 %v3779_v40, %v2159_v44 }
 0x1ca   : > { %v2252_v21 = vmax.f32 %v2236_v38, 0.0  ;;  %v2227_v1 = vadd.f32 3.0, %v2211_v22  ;;  %v2222_v32 = vadd.f32 %v3778_v46, %v5131_v63  ;;  %v3768_v47 = vadd.f32 %v2119_v7, %v1195_v5 }
 0x1cb   : > { %v2244_v19 = vmax.f32 %v2228_v45, 0.0  ;;  %v2251_v20 = vmax.f32 %v2235_v49, 0.0  ;;  %v2214_v42 = vadd.f32 %v3767_v3, %v5131_v63  ;;  %v2221_v43 = vadd.f32 %v3780_v0, %v5131_v63  ;;  %v3457_v53 = vpop.f32.mrb[20].mxu1 }
 0x1cc   : > { %v2268_v8 = vmin.f32 %v2252_v21, 6.0  ;;  %v2243_v13 = vmax.f32 %v2227_v1, 0.0  ;;  %v2238_v2 = vadd.f32 3.0, %v2222_v32  ;;  %v2213_v55 = vadd.f32 %v3768_v47, %v5131_v63  ;;  %v3445_v37 = vpop.f32.mrb[4].mxu0  ;;  %v2169_v14 = vpop.f32.mrb[21].mxu1 }
 0x1cd   : > { %v2260_v34 = vmin.f32 %v2244_v19, 6.0  ;;  %v2267_v26 = vmin.f32 %v2251_v20, 6.0  ;;  %v2230_v57 = vadd.f32 3.0, %v2214_v42  ;;  %v2237_v9 = vadd.f32 3.0, %v2221_v43  ;;  %v2129_v48 = vpop.f32.mrb[5].mxu0 }
 0x1ce   : > { %v2284_v5 = vmul.f32 %v2268_v8, %v2220_v61  ;;  %v2259_v24 = vmin.f32 %v2243_v13, 6.0  ;;  %v2254_v4 = vmax.f32 %v2238_v2, 0.0  ;;  %v2229_v12 = vadd.f32 3.0, %v2213_v55 }
 0x1cf   : > { %v2276_v40 = vmul.f32 %v2260_v34, %v2212_v30  ;;  %v2283_v58 = vmul.f32 %v2267_v26, %v2219_v10  ;;  %v2246_v51 = vmax.f32 %v2230_v57, 0.0  ;;  %v2253_v36 = vmax.f32 %v2237_v9, 0.0  ;;  %v3460_v15 = vpop.f32.mrb[22].mxu1 }
 0x1d0   : > { %v2300_v39 = vmul.f32 0.16666667, %v2284_v5  ;;  %v2275_v52 = vmul.f32 %v2259_v24, %v2211_v22  ;;  %v2270_v35 = vmin.f32 %v2254_v4, 6.0  ;;  %v2245_v41 = vmax.f32 %v2229_v12, 0.0  ;;  %v3448_v59 = vpop.f32.mrb[6].mxu0  ;;  %v2179_v60 = vpop.f32.mrb[23].mxu1 }
 0x1d1   : > { %v2292_v54 = vmul.f32 0.16666667, %v2276_v40  ;;  %v2299_v6 = vmul.f32 0.16666667, %v2283_v58  ;;  %v2262_v27 = vmin.f32 %v2246_v51, 6.0  ;;  %v2269_v28 = vmin.f32 %v2253_v36, 6.0 }
 0x1d2   : > { %2316 = vst [vmem:[%s4166_s11 + $0x48] sm:$0xff] %v2300_v39  ;;  %v2291_v17 = vmul.f32 0.16666667, %v2275_v52  ;;  %v2286_v61 = vmul.f32 %v2270_v35, %v2222_v32  ;;  %v2261_v62 = vmin.f32 %v2245_v41, 6.0  ;;  %v3769_v30 = vadd.f32 %v3445_v37, %v5112_v18  ;;  %v2139_v10 = vpop.f32.mrb[7].mxu0 }
 0x1d3   : > { %2308 = vst [vmem:[%s4166_s11 + $0x8] sm:$0xff] %v2292_v54  ;;  %2315 = vst [vmem:[%s4166_s11 + $0x40] sm:$0xff] %v2299_v6  ;;  %v2278_v11 = vmul.f32 %v2262_v27, %v2214_v42  ;;  %v2285_v38 = vmul.f32 %v2269_v28, %v2221_v43  ;;  %v3782_v22 = vadd.f32 %v5120_v25, %v3457_v53 }
 0x1d4   : > { %v3770_v23 = vadd.f32 %v2129_v48, %v5114_v33  ;;  %2307 = vst [vmem:[%s4166_s11] sm:$0xff] %v2291_v17  ;;  %v2302_v46 = vmul.f32 0.16666667, %v2286_v61  ;;  %v2277_v44 = vmul.f32 %v2261_v62, %v2213_v55  ;;  %v2216_v45 = vadd.f32 %v3769_v30, %v5131_v63 }
 0x1d5   : > { %v3784_v49 = vadd.f32 %v5122_v29, %v2169_v14  ;;  %v2294_v18 = vmul.f32 0.16666667, %v2278_v11  ;;  %v2301_v3 = vmul.f32 0.16666667, %v2285_v38  ;;  %v2224_v7 = vadd.f32 %v3782_v22, %v5131_v63 }
 0x1d6   : > { %v2215_v0 = vadd.f32 %v3770_v23, %v5131_v63  ;;  %2318 = vst [vmem:[%s4166_s11 + $0x58] sm:$0xff] %v2302_v46  ;;  %v2293_v25 = vmul.f32 0.16666667, %v2277_v44  ;;  %v2232_v21 = vadd.f32 3.0, %v2216_v45  ;;  %v3771_v1 = vadd.f32 %v3448_v59, %v5116_v50 }
 0x1d7   : > { %v2223_v33 = vadd.f32 %v3784_v49, %v5131_v63  ;;  %2310 = vst [vmem:[%s4166_s11 + $0x18] sm:$0xff] %v2294_v18  ;;  %2317 = vst [vmem:[%s4166_s11 + $0x50] sm:$0xff] %v2301_v3  ;;  %v2240_v32 = vadd.f32 3.0, %v2224_v7  ;;  %v3786_v29 = vadd.f32 %v5124_v31, %v3460_v15  ;;  %v3772_v19 = vadd.f32 %v2139_v10, %v5118_v56 }
 0x1d8   : > { %v2231_v47 = vadd.f32 3.0, %v2215_v0  ;;  %2309 = vst [vmem:[%s4166_s11 + $0x10] sm:$0xff] %v2293_v25  ;;  %v2248_v20 = vmax.f32 %v2232_v21, 0.0  ;;  %v2218_v43 = vadd.f32 %v3771_v1, %v5131_v63  ;;  %v3788_v53 = vadd.f32 %v5126_v16, %v2179_v60 }
 0x1d9   : > { %v2239_v42 = vadd.f32 3.0, %v2223_v33  ;;  %v2256_v8 = vmax.f32 %v2240_v32, 0.0  ;;  %v2226_v50 = vadd.f32 %v3786_v29, %v5131_v63  ;;  %v2217_v2 = vadd.f32 %v3772_v19, %v5131_v63 }
 0x1da   : > { %v2247_v13 = vmax.f32 %v2231_v47, 0.0  ;;  %v2264_v55 = vmin.f32 %v2248_v20, 6.0  ;;  %v2234_v14 = vadd.f32 3.0, %v2218_v43  ;;  %v2225_v31 = vadd.f32 %v3788_v53, %v5131_v63 }
 0x1db   : > { %v2255_v37 = vmax.f32 %v2239_v42, 0.0  ;;  %v2272_v56 = vmin.f32 %v2256_v8, 6.0  ;;  %v2242_v26 = vadd.f32 3.0, %v2226_v50  ;;  %v2233_v57 = vadd.f32 3.0, %v2217_v2 }
 0x1dc   : > { %v2263_v34 = vmin.f32 %v2247_v13, 6.0  ;;  %v2280_v9 = vmul.f32 %v2264_v55, %v2216_v45  ;;  %v2250_v16 = vmax.f32 %v2234_v14, 0.0  ;;  %v2241_v5 = vadd.f32 3.0, %v2225_v31 }
 0x1dd   : > { %v2271_v48 = vmin.f32 %v2255_v37, 6.0  ;;  %v2288_v24 = vmul.f32 %v2272_v56, %v2224_v7  ;;  %v2258_v12 = vmax.f32 %v2242_v26, 0.0  ;;  %v2249_v40 = vmax.f32 %v2233_v57, 0.0 }
 0x1de   : > { %v2279_v4 = vmul.f32 %v2263_v34, %v2215_v0  ;;  %v2296_v63 = vmul.f32 0.16666667, %v2280_v9  ;;  %v2266_v51 = vmin.f32 %v2250_v16, 6.0  ;;  %v2257_v36 = vmax.f32 %v2241_v5, 0.0 }
 0x1df   : > { %v2287_v58 = vmul.f32 %v2271_v48, %v2223_v33  ;;  %v2304_v15 = vmul.f32 0.16666667, %v2288_v24  ;;  %v2274_v52 = vmin.f32 %v2258_v12, 6.0  ;;  %v2265_v35 = vmin.f32 %v2249_v40, 6.0 }
 0x1e0   : > { %v2295_v39 = vmul.f32 0.16666667, %v2279_v4  ;;  %2312 = vst [vmem:[%s4166_s11 + $0x28] sm:$0xff] %v2296_v63  ;;  %v2282_v59 = vmul.f32 %v2266_v51, %v2218_v43  ;;  %v2273_v60 = vmin.f32 %v2257_v36, 6.0 }
 0x1e1   : > { %v2303_v41 = vmul.f32 0.16666667, %v2287_v58  ;;  %2320 = vst [vmem:[%s4166_s11 + $0x68] sm:$0xff] %v2304_v15  ;;  %v2290_v54 = vmul.f32 %v2274_v52, %v2226_v50  ;;  %v2281_v6 = vmul.f32 %v2265_v35, %v2217_v2 }
 0x1e2   : > { %2311 = vst [vmem:[%s4166_s11 + $0x20] sm:$0xff] %v2295_v39  ;;  %v2298_v27 = vmul.f32 0.16666667, %v2282_v59  ;;  %v2289_v28 = vmul.f32 %v2273_v60, %v2225_v31 }
 0x1e3   : > { %2319 = vst [vmem:[%s4166_s11 + $0x60] sm:$0xff] %v2303_v41  ;;  %v2306_v17 = vmul.f32 0.16666667, %v2290_v54  ;;  %v2297_v61 = vmul.f32 0.16666667, %v2281_v6 }
 0x1e4   : > { %2314 = vst [vmem:[%s4166_s11 + $0x38] sm:$0xff] %v2298_v27  ;;  %v2305_v62 = vmul.f32 0.16666667, %v2289_v28 }
 0x1e5   : > { %2322 = vst [vmem:[%s4166_s11 + $0x78] sm:$0xff] %v2306_v17  ;;  %2313 = vst [vmem:[%s4166_s11 + $0x30] sm:$0xff] %v2297_v61 }
 0x1e6   : > { %2321 = vst [vmem:[%s4166_s11 + $0x70] sm:$0xff] %v2305_v62 }
 0x1e7   : > { %3979 = shalt.err (!%p3976_p10)
}
 0x1e8   : > { %s3980_s11 = scalar_lea.hbm %s5175_s27, 2048  ;;  %s3984_s20 = scalar_lea.hbm %s5240_s3, 8192 }
 0x1e9   : > { %p3981_p11 = scmp.ne.s32.totalorder %s5175_s27, %s3980_s11  ;;  %p3985_p0 = scmp.lt.u32.totalorder %s5175_s27, %s5240_s3 }
 0x1ea   : > { %p3986_p1 = scmp.lt.u32.totalorder %s3984_s20, %s3980_s11  ;;  %p3988_p4 = scmp.lt.u32.totalorder %s3980_s11, %s5175_s27 }
 0x1eb   : > { %p3982_p12 = pnand %p3981_p11, %p4138_p3 }
 0x1ec   : > { %p3987_p2 = por %p3986_p1, %p3985_p0 }
 0x1ed   : > { %p3983_p13 = pneg %p3982_p12 }
 0x1ee   : > { %p3989_p5 = por %p3988_p4, %p3987_p2 }
 0x1f0   : > { %p3990_p6 = pnand %p3989_p5, %p3983_p13 }
 0x1f2   : > { %3993 = shalt.err (!%p3990_p6)
}
 0x1f3   : > { %s4065_s4 = smov 128   ;;  %s4066_s24 = smov 8  }
 0x1f4   : > { %3893 = dma.vmem_to_hbm [thread:$0]  (%p4138_p3), %s5177_s16, 2048, %s5175_s27, %s5185_s10, %s4065_s4, %s4065_s4, %s4066_s24  }
 0x1f5 PF: > { %p3899_p7 = scmp.ge.s32.totalorder %s4062_s19, 2  ;;  %s2355_s28 = sand.u32 1, %s4034_s12  }
 0x1f6   : > { %s2356_s7 = scalar_lea.sflag [#allocation5], %s2355_s28 }
 0x1f7   : > { %p3896_p9 = pnand %p3899_p7, %p4147_p8 }
 0x1f9   : > { %4029 = dma.done.wait (!%p3896_p9), %s2356_s7, 2048  }
 0x1fa   : > { %4031 = vsyncadd (!%p3896_p9), %s2356_s7, 4294965248  ;;  %s16_s19 = sadd.s32 1, %s4062_s19   ;;  %s5245_s12 = smov %s4038_s13 }
 0x1fb   : > { %p13_p10 = scmp.ge.s32.totalorder %s16_s19, 6   ;;  %s5246_s13 = smov %s4042_s14 }
 0x1fc   : > { %s5247_s14 = smov %s4156_s30  ;;  %s5248_s15 = smov %s4054_s17 }
 0x1fd   : > { %s5249_s16 = smov %s4058_s18  ;;  %s5250_s17 = smov %s5253_s22 }
 0x1fe   : > { %s5251_s18 = smov %s5257_s23  ;;  %15 = sbr.rel (!%p13_p10) target bundleno = 5 (0x5), region = 185 }
 0x205   :  { %2361 = vsyncpa [#allocation5], 1 }
 0x206   :  { %2363 = vsyncpa [#allocation5 + $0x1], 1 }
 0x207   :  { %2364 = vsyncmov [#allocation3] }
 0x20a   :  { %s2365_s25 = vpop.sfrf %2364 }
 0x20b   :  { %p2666_p3 = scmp.ne.s32.totalorder %s2365_s25, 0 }
 0x20d   :  { %2369 = shalt.err (%p2666_p3)  }
 0x20e   :  { %2371 = vsyncmov [#allocation3 + $0x1] }
 0x211   :  { %s2372_s26 = vpop.sfrf %2371 }
 0x212   :  { %p2667_p8 = scmp.ne.s32.totalorder %s2372_s26, 0 }
 0x214   :  { %2376 = shalt.err (%p2667_p8)  }

</bundles_post_ra>
